<compile_context>
chip_gen: v7x
topology: tpu7x:2x2x1
jax: 0.10.0
libtpu: 0.0.40
codegen_flags: <defaults>
</compile_context>

<pallas_src>
import jax
import jax.numpy as jnp
from jax.experimental import pallas as pl
from jax.experimental.pallas import tpu as pltpu

K1 = 30          # SlitCNN.kernel_size_1[0]
K2 = 8           # SlitCNN.kernel_size_2[0]
LEAKY_SLOPE = 0.01
LN_EPS = 1e-5
VMEM_BUDGET = 32 * 1024 * 1024   # safe scoped-VMEM limit on v5e/v6e/v7x


def _leaky(x):
    return jnp.where(x > 0, x, LEAKY_SLOPE * x)


# ----------------------------- Pallas kernel --------------------------------

def slit_block_kernel(x_ref, w1_ref, b1_ref, g_ref, be_ref,
                      w2_ref, b2_ref, wf1_ref, bf1_ref, o_ref):
    """CB column towers per grid step; writes a (Bp, CB*128) feature slab."""
    cb, bp, _ = x_ref.shape
    win = w2_ref.shape[1]            # K2 * 64
    l3 = wf1_ref.shape[1] // 128     # pooled positions per column

    for c in range(cb):              # static unroll over the columns in this block
        # conv1 (1 -> 64, kernel (K1,1)) as one MXU matmul against the bf16
        # Toeplitz-embedded weight (R, L1*64); f32 accumulation; the output is
        # kept flattened (batch, position*channel) with channel fastest.
        # TODO(synk): for very large num_rows swap the Toeplitz weight for raw
        # (K1, 64) taps + in-kernel im2col (v7x has only 64 MiB VMEM).
        x = x_ref[c]                                             # (Bp, R) f32
        h1 = jnp.dot(x.astype(jnp.bfloat16), w1_ref[c],
                     preferred_element_type=jnp.float32) + b1_ref[c]
        h1 = _leaky(h1)                                          # (Bp, L1*64) f32

        # LayerNorm([64, L1, 1]): centered two-pass statistics, all f32.
        mean = jnp.mean(h1, axis=1, keepdims=True)
        cen = h1 - mean
        var = jnp.mean(cen * cen, axis=1, keepdims=True)
        h1 = cen * jax.lax.rsqrt(var + LN_EPS) * g_ref[c] + be_ref[c]

        # conv2 (64 -> 128, kernel (K2,1)) + LeakyReLU + MaxPool((2,1)) fused
        # as ONE stacked matmul.  The window of output position p is the
        # contiguous slice h1[:, p*64 : p*64 + K2*64]; even positions are
        # 128-lane aligned, odd positions are read (128-aligned) from a single
        # 64-lane-shifted copy, so only one lane relayout is paid per column.
        h1s = h1[:, 64:]                                         # shift by one position
        rows = []
        for q in range(l3):
            rows.append(h1[:, 128 * q: 128 * q + win])           # position 2q
            rows.append(h1s[:, 128 * q: 128 * q + win])          # position 2q + 1
        lhs = jnp.concatenate(rows, axis=0).astype(jnp.bfloat16)  # (2*L3*Bp, K2*64)
        h2 = jnp.dot(lhs, w2_ref[c],
                     preferred_element_type=jnp.float32) + b2_ref[c]
        h2 = _leaky(h2)                                          # (2*L3*Bp, 128) f32
        # MaxPool((2,1)): max over paired position row-blocks, re-laid as lanes.
        pooled = jnp.concatenate(
            [jnp.maximum(h2[(2 * q) * bp:(2 * q + 1) * bp],
                         h2[(2 * q + 1) * bp:(2 * q + 2) * bp])
             for q in range(l3)], axis=1)                        # (Bp, L3*128) f32

        # flatten + fc1 as a single matmul, then LeakyReLU.
        # TODO(synk): nn.Dropout(0.25) is applied as identity (inference mode).
        h3 = jnp.dot(pooled.astype(jnp.bfloat16), wf1_ref[c],
                     preferred_element_type=jnp.float32) + bf1_ref[c]
        h3 = _leaky(h3)                                          # (Bp, 128)

        # Lane-dense 128-wide store of this column's features.
        o_ref[:, c * 128:(c + 1) * 128] = h3


# ------------------------- parameter setup (glue) ---------------------------

def make_params(key, num_rows, num_cols):
    """Deterministic synthetic parameters (shapes implied by SlitCNN.__init__)."""
    L1 = num_rows - K1 + 1
    L2 = L1 - K2 + 1
    L3 = L2 // 2
    ks = jax.random.split(key, 10)
    n = jax.random.normal
    return dict(
        # conv1[i].weight: (64, 1, K1, 1)  -> stored as (C, K1, 64)
        w1=n(ks[0], (num_cols, K1, 64), jnp.float32) / jnp.sqrt(K1),
        b1=0.05 * n(ks[1], (num_cols, 64), jnp.float32),
        # LayerNorm([64, L1, 1]) affine -> stored as (C, L1, 64)
        gamma=1.0 + 0.1 * n(ks[2], (num_cols, L1, 64), jnp.float32),
        beta=0.1 * n(ks[3], (num_cols, L1, 64), jnp.float32),
        # conv2[i].weight: (128, 64, K2, 1) -> stored as (C, K2, 64, 128)
        w2=n(ks[4], (num_cols, K2, 64, 128), jnp.float32) / jnp.sqrt(64 * K2),
        b2=0.05 * n(ks[5], (num_cols, 128), jnp.float32),
        # fc1[i].weight: (128, 128*L3) -> stored as (C, L3, 128in, 128out)
        # (PyTorch's NCHW channel-major flatten only permutes this synthetic
        #  weight; semantics are identical.)
        wf1=n(ks[6], (num_cols, L3, 128, 128), jnp.float32) / jnp.sqrt(128 * L3),
        bf1=0.05 * n(ks[7], (num_cols, 128), jnp.float32),
        # fc2.weight: (num_cols, 128*num_cols) -> stored transposed
        wf2=n(ks[8], (num_cols * 128, num_cols), jnp.float32) / jnp.sqrt(128 * num_cols),
        bf2=0.05 * n(ks[9], (num_cols,), jnp.float32),
    )


def _toeplitz_conv1(w1, num_rows):
    # w1: (C, K1, 64) -> (C, R, L1*64) with W[c, r, p*64+o] = w1[c, r-p, o]
    C, k1, O = w1.shape
    L1 = num_rows - k1 + 1
    r = jnp.arange(num_rows)[:, None]
    p = jnp.arange(L1)[None, :]
    tap = r - p
    valid = (tap >= 0) & (tap < k1)
    tap = jnp.clip(tap, 0, k1 - 1)
    w = w1[:, tap, :]                                # (C, R, L1, 64)
    w = jnp.where(valid[None, :, :, None], w, 0.0)
    return w.reshape(C, num_rows, L1 * O)


def _pad_cols(a, c_pad):
    pad = c_pad - a.shape[0]
    if pad == 0:
        return a
    return jnp.pad(a, [(0, pad)] + [(0, 0)] * (a.ndim - 1))


# ------------------------------ forward pass --------------------------------

def slit_cnn_forward(x, params, column_block=None):
    B, R, C = x.shape
    L1 = R - K1 + 1
    L2 = L1 - K2 + 1
    L3 = L2 // 2
    assert L3 >= 1, "num_rows too small for this architecture"
    Bp = max(8, ((B + 7) // 8) * 8)                  # pad batch to >=8 sublanes

    # Columns per grid step: amortizes per-step pipeline overhead while keeping
    # >= 2 grid steps when possible so the "parallel" axis can use both v7x TCs.
    CB = column_block if column_block is not None else max(1, min(4, -(-C // 2)))
    G = -(-C // CB)                                  # grid steps
    Cp = G * CB                                      # columns padded (zero weights)

    x_cols = jnp.transpose(x, (2, 0, 1)).astype(jnp.float32)        # (C, B, R)
    x_cols = jnp.pad(x_cols, ((0, Cp - C), (0, Bp - B), (0, 0)))

    # Weights streamed to the MXU are bf16 (halves weight HBM bytes); biases
    # and LayerNorm affine stay f32, all accumulation is f32.
    w1_t = _pad_cols(_toeplitz_conv1(params["w1"], R), Cp).astype(jnp.bfloat16)
    b1_f = _pad_cols(jnp.broadcast_to(params["b1"][:, None, :],
                                      (C, L1, 64)).reshape(C, 1, L1 * 64), Cp)
    g_f = _pad_cols(params["gamma"].reshape(C, 1, L1 * 64), Cp)
    be_f = _pad_cols(params["beta"].reshape(C, 1, L1 * 64), Cp)
    w2_m = _pad_cols(params["w2"].reshape(C, K2 * 64, 128), Cp).astype(jnp.bfloat16)
    b2_f = _pad_cols(params["b2"].reshape(C, 1, 128), Cp)
    wf1_m = _pad_cols(params["wf1"].reshape(C, L3 * 128, 128), Cp).astype(jnp.bfloat16)
    bf1_f = _pad_cols(params["bf1"].reshape(C, 1, 128), Cp)

    # VMEM sanity: one block of every operand, double-buffered, must fit.
    block_bytes = (CB * Bp * R * 4 + CB * R * L1 * 64 * 2
                   + 3 * CB * L1 * 64 * 4
                   + CB * K2 * 64 * 128 * 2 + CB * 128 * 4
                   + CB * L3 * 128 * 128 * 2 + CB * 128 * 4
                   + Bp * CB * 128 * 4)
    assert 2 * block_bytes < VMEM_BUDGET, (block_bytes, VMEM_BUDGET)

    col_map = lambda i: (i, 0, 0)
    feats = pl.pallas_call(
        slit_block_kernel,
        out_shape=jax.ShapeDtypeStruct((Bp, Cp * 128), jnp.float32),
        grid=(G,),
        in_specs=[
            pl.BlockSpec((CB, Bp, R), col_map),
            pl.BlockSpec((CB, R, L1 * 64), col_map),
            pl.BlockSpec((CB, 1, L1 * 64), col_map),
            pl.BlockSpec((CB, 1, L1 * 64), col_map),
            pl.BlockSpec((CB, 1, L1 * 64), col_map),
            pl.BlockSpec((CB, K2 * 64, 128), col_map),
            pl.BlockSpec((CB, 1, 128), col_map),
            pl.BlockSpec((CB, L3 * 128, 128), col_map),
            pl.BlockSpec((CB, 1, 128), col_map),
        ],
        # Disjoint lane-dense output slab per grid step -> the column axis is
        # fully parallel (megacore-shardable) and output stores are unmasked.
        out_specs=pl.BlockSpec((Bp, CB * 128), lambda i: (0, i)),
        compiler_params=pltpu.CompilerParams(
            dimension_semantics=("parallel",),
            vmem_limit_bytes=VMEM_BUDGET),
    )(x_cols, w1_t, b1_f, g_f, be_f, w2_m, b2_f, wf1_m, bf1_f)

    # fc2: tiny (B, C*128) @ (C*128, C) -- cheaper in XLA than as a fused
    # resident accumulator (which would force the grid axis to "arbitrary").
    feats = feats[:B, :C * 128]
    return feats @ params["wf2"] + params["bf2"][None, :]


# --------------------------- pure-JAX reference -----------------------------

def reference_forward(x, params):
    B, R, C = x.shape
    L1 = R - K1 + 1
    L2 = L1 - K2 + 1
    L3 = L2 // 2
    outs = []
    for c in range(C):
        xc = x[:, :, c]
        h1 = jnp.zeros((B, L1, 64), jnp.float32)
        for k in range(K1):
            h1 = h1 + xc[:, k:k + L1, None] * params["w1"][c, k][None, None, :]
        h1 = _leaky(h1 + params["b1"][c][None, None, :])
        mean = jnp.mean(h1, axis=(1, 2), keepdims=True)
        var = jnp.mean((h1 - mean) ** 2, axis=(1, 2), keepdims=True)
        h1 = (h1 - mean) / jnp.sqrt(var + LN_EPS)
        h1 = h1 * params["gamma"][c][None] + params["beta"][c][None]
        h2 = jnp.zeros((B, L2, 128), jnp.float32)
        for k in range(K2):
            h2 = h2 + jnp.einsum("bpi,io->bpo",
                                 h1[:, k:k + L2, :], params["w2"][c, k])
        h2 = _leaky(h2 + params["b2"][c][None, None, :])
        pooled = jnp.max(h2[:, :2 * L3, :].reshape(B, L3, 2, 128), axis=2)
        h3 = jnp.einsum("bpi,pio->bo", pooled, params["wf1"][c]) + params["bf1"][c]
        outs.append(_leaky(h3))
    feats = jnp.concatenate(outs, axis=1)
    return feats @ params["wf2"] + params["bf2"]


# ---------------------------------- main -------------------------------------

if __name__ == "__main__":
    # Module config: num_rows must be >= 39 so that L2 >= 2; num_classes unused
    # by forward().  Batch > 1 so torch.squeeze keeps the batch dim.
    num_rows, num_cols, num_classes = 40, 3, 3
    batch = 2

    key = jax.random.PRNGKey(0)
    kx, kp = jax.random.split(key)
    x = jax.random.normal(kx, (batch, num_rows, num_cols), jnp.float32)
    params = make_params(kp, num_rows, num_cols)

    out = jax.block_until_ready(slit_cnn_forward(x, params))
    ref = jax.block_until_ready(reference_forward(x, params))

    assert out.shape == (batch, num_cols), out.shape
    assert bool(jnp.all(jnp.isfinite(out)))
    assert bool(jnp.allclose(out, ref, rtol=1e-1, atol=1e-1)), (out, ref)
    print("KERNEL_OK")
</pallas_src>

<mosaic_0001>
module attributes {stable_mosaic.version = 11 : i64} {
  func.func @slit_block_kernel(%arg0: i32, %arg1: memref<2x8x40xf32, #tpu.memory_space<vmem>>, %arg2: memref<2x40x704xbf16, #tpu.memory_space<vmem>>, %arg3: memref<2x1x704xf32, #tpu.memory_space<vmem>>, %arg4: memref<2x1x704xf32, #tpu.memory_space<vmem>>, %arg5: memref<2x1x704xf32, #tpu.memory_space<vmem>>, %arg6: memref<2x512x128xbf16, #tpu.memory_space<vmem>>, %arg7: memref<2x1x128xf32, #tpu.memory_space<vmem>>, %arg8: memref<2x256x128xbf16, #tpu.memory_space<vmem>>, %arg9: memref<2x1x128xf32, #tpu.memory_space<vmem>>, %arg10: memref<8x256xf32, #tpu.memory_space<vmem>>) attributes {dimension_semantics = [#tpu.dimension_semantics<parallel>], iteration_bounds = array<i64: 2>, scalar_prefetch = 0 : i64, scratch_operands = 0 : i64, tpu.core_type = #tpu.core_type<tc>, window_params = [{transform_indices = @transform_0, window_bounds = array<i64: 2, 8, 40>}, {transform_indices = @transform_1, window_bounds = array<i64: 2, 40, 704>}, {transform_indices = @transform_2, window_bounds = array<i64: 2, 1, 704>}, {transform_indices = @transform_3, window_bounds = array<i64: 2, 1, 704>}, {transform_indices = @transform_4, window_bounds = array<i64: 2, 1, 704>}, {transform_indices = @transform_5, window_bounds = array<i64: 2, 512, 128>}, {transform_indices = @transform_6, window_bounds = array<i64: 2, 1, 128>}, {transform_indices = @transform_7, window_bounds = array<i64: 2, 256, 128>}, {transform_indices = @transform_8, window_bounds = array<i64: 2, 1, 128>}, {transform_indices = @transform_9, window_bounds = array<i64: 8, 256>}]} {
    %c0 = arith.constant 0 : index
    %c0_0 = arith.constant 0 : index
    %c0_1 = arith.constant 0 : index
    %0 = vector.load %arg1[%c0, %c0_0, %c0_1] : memref<2x8x40xf32, #tpu.memory_space<vmem>>, vector<1x8x40xf32>
    %1 = vector.shape_cast %0 : vector<1x8x40xf32> to vector<8x40xf32>
    %2 = arith.truncf %1 : vector<8x40xf32> to vector<8x40xbf16>
    %c0_2 = arith.constant 0 : index
    %c0_3 = arith.constant 0 : index
    %c0_4 = arith.constant 0 : index
    %3 = vector.load %arg2[%c0_2, %c0_3, %c0_4] : memref<2x40x704xbf16, #tpu.memory_space<vmem>>, vector<1x40x704xbf16>
    %4 = vector.shape_cast %3 : vector<1x40x704xbf16> to vector<40x704xbf16>
    %cst = arith.constant dense<0.000000e+00> : vector<8x704xf32>
    %5 = tpu.matmul %2, %4, %cst {dimension_numbers = #tpu.dot_dimension_numbers<[1], [0], [0], [1], [0, 0, 1, 1], [], []>} : vector<8x40xbf16>, vector<40x704xbf16>, vector<8x704xf32> -> vector<8x704xf32>
    %c0_5 = arith.constant 0 : index
    %c0_6 = arith.constant 0 : index
    %c0_7 = arith.constant 0 : index
    %6 = vector.load %arg3[%c0_5, %c0_6, %c0_7] : memref<2x1x704xf32, #tpu.memory_space<vmem>>, vector<1x1x704xf32>
    %7 = vector.shape_cast %6 : vector<1x1x704xf32> to vector<1x704xf32>
    %8 = vector.broadcast %7 : vector<1x704xf32> to vector<8x704xf32>
    %9 = arith.addf %5, %8 : vector<8x704xf32>
    %cst_8 = arith.constant 0.000000e+00 : f32
    %10 = vector.broadcast %cst_8 : f32 to vector<8x704xf32>
    %11 = arith.cmpf ogt, %9, %10 : vector<8x704xf32>
    %cst_9 = arith.constant 0.00999999977 : f32
    %12 = vector.broadcast %cst_9 : f32 to vector<8x704xf32>
    %13 = arith.mulf %12, %9 : vector<8x704xf32>
    %14 = arith.select %11, %9, %13 : vector<8x704xi1>, vector<8x704xf32>
    %cst_10 = arith.constant dense<0.000000e+00> : vector<8xf32>
    %15 = vector.multi_reduction <add>, %14, %cst_10 [1] : vector<8x704xf32> to vector<8xf32>
    %16 = vector.shape_cast %15 : vector<8xf32> to vector<8x1xf32>
    %cst_11 = arith.constant 7.040000e+02 : f32
    %17 = vector.broadcast %cst_11 : f32 to vector<8x1xf32>
    %18 = arith.divf %16, %17 : vector<8x1xf32>
    %19 = vector.broadcast %18 : vector<8x1xf32> to vector<8x704xf32>
    %20 = arith.subf %14, %19 : vector<8x704xf32>
    %21 = arith.mulf %20, %20 : vector<8x704xf32>
    %cst_12 = arith.constant dense<0.000000e+00> : vector<8xf32>
    %22 = vector.multi_reduction <add>, %21, %cst_12 [1] : vector<8x704xf32> to vector<8xf32>
    %23 = vector.shape_cast %22 : vector<8xf32> to vector<8x1xf32>
    %cst_13 = arith.constant 7.040000e+02 : f32
    %24 = vector.broadcast %cst_13 : f32 to vector<8x1xf32>
    %25 = arith.divf %23, %24 : vector<8x1xf32>
    %cst_14 = arith.constant 9.99999974E-6 : f32
    %26 = vector.broadcast %cst_14 : f32 to vector<8x1xf32>
    %27 = arith.addf %25, %26 : vector<8x1xf32>
    %28 = math.rsqrt %27 : vector<8x1xf32>
    %29 = vector.broadcast %28 : vector<8x1xf32> to vector<8x704xf32>
    %30 = arith.mulf %20, %29 : vector<8x704xf32>
    %c0_15 = arith.constant 0 : index
    %c0_16 = arith.constant 0 : index
    %c0_17 = arith.constant 0 : index
    %31 = vector.load %arg4[%c0_15, %c0_16, %c0_17] : memref<2x1x704xf32, #tpu.memory_space<vmem>>, vector<1x1x704xf32>
    %32 = vector.shape_cast %31 : vector<1x1x704xf32> to vector<1x704xf32>
    %33 = vector.broadcast %32 : vector<1x704xf32> to vector<8x704xf32>
    %34 = arith.mulf %30, %33 : vector<8x704xf32>
    %c0_18 = arith.constant 0 : index
    %c0_19 = arith.constant 0 : index
    %c0_20 = arith.constant 0 : index
    %35 = vector.load %arg5[%c0_18, %c0_19, %c0_20] : memref<2x1x704xf32, #tpu.memory_space<vmem>>, vector<1x1x704xf32>
    %36 = vector.shape_cast %35 : vector<1x1x704xf32> to vector<1x704xf32>
    %37 = vector.broadcast %36 : vector<1x704xf32> to vector<8x704xf32>
    %38 = arith.addf %34, %37 : vector<8x704xf32>
    %39 = vector.extract_strided_slice %38 {offsets = [0, 64], sizes = [8, 640], strides = [1, 1]} : vector<8x704xf32> to vector<8x640xf32>
    %40 = vector.extract_strided_slice %38 {offsets = [0, 0], sizes = [8, 512], strides = [1, 1]} : vector<8x704xf32> to vector<8x512xf32>
    %41 = vector.extract_strided_slice %39 {offsets = [0, 0], sizes = [8, 512], strides = [1, 1]} : vector<8x640xf32> to vector<8x512xf32>
    %42 = vector.extract_strided_slice %38 {offsets = [0, 128], sizes = [8, 512], strides = [1, 1]} : vector<8x704xf32> to vector<8x512xf32>
    %43 = vector.extract_strided_slice %39 {offsets = [0, 128], sizes = [8, 512], strides = [1, 1]} : vector<8x640xf32> to vector<8x512xf32>
    %44 = tpu.concatenate %40, %41, %42, %43 in 0 : vector<8x512xf32>, vector<8x512xf32>, vector<8x512xf32>, vector<8x512xf32> -> vector<32x512xf32>
    %45 = arith.truncf %44 : vector<32x512xf32> to vector<32x512xbf16>
    %c0_21 = arith.constant 0 : index
    %c0_22 = arith.constant 0 : index
    %c0_23 = arith.constant 0 : index
    %46 = vector.load %arg6[%c0_21, %c0_22, %c0_23] : memref<2x512x128xbf16, #tpu.memory_space<vmem>>, vector<1x512x128xbf16>
    %47 = vector.shape_cast %46 : vector<1x512x128xbf16> to vector<512x128xbf16>
    %cst_24 = arith.constant dense<0.000000e+00> : vector<32x128xf32>
    %48 = tpu.matmul %45, %47, %cst_24 {dimension_numbers = #tpu.dot_dimension_numbers<[1], [0], [0], [1], [0, 0, 1, 1], [], []>} : vector<32x512xbf16>, vector<512x128xbf16>, vector<32x128xf32> -> vector<32x128xf32>
    %c0_25 = arith.constant 0 : index
    %c0_26 = arith.constant 0 : index
    %c0_27 = arith.constant 0 : index
    %49 = vector.load %arg7[%c0_25, %c0_26, %c0_27] : memref<2x1x128xf32, #tpu.memory_space<vmem>>, vector<1x1x128xf32>
    %50 = vector.shape_cast %49 : vector<1x1x128xf32> to vector<1x128xf32>
    %51 = vector.broadcast %50 : vector<1x128xf32> to vector<32x128xf32>
    %52 = arith.addf %48, %51 : vector<32x128xf32>
    %cst_28 = arith.constant 0.000000e+00 : f32
    %53 = vector.broadcast %cst_28 : f32 to vector<32x128xf32>
    %54 = arith.cmpf ogt, %52, %53 : vector<32x128xf32>
    %cst_29 = arith.constant 0.00999999977 : f32
    %55 = vector.broadcast %cst_29 : f32 to vector<32x128xf32>
    %56 = arith.mulf %55, %52 : vector<32x128xf32>
    %57 = arith.select %54, %52, %56 : vector<32x128xi1>, vector<32x128xf32>
    %58 = vector.extract_strided_slice %57 {offsets = [0, 0], sizes = [8, 128], strides = [1, 1]} : vector<32x128xf32> to vector<8x128xf32>
    %59 = vector.extract_strided_slice %57 {offsets = [8, 0], sizes = [8, 128], strides = [1, 1]} : vector<32x128xf32> to vector<8x128xf32>
    %60 = arith.maximumf %58, %59 : vector<8x128xf32>
    %61 = vector.extract_strided_slice %57 {offsets = [16, 0], sizes = [8, 128], strides = [1, 1]} : vector<32x128xf32> to vector<8x128xf32>
    %62 = vector.extract_strided_slice %57 {offsets = [24, 0], sizes = [8, 128], strides = [1, 1]} : vector<32x128xf32> to vector<8x128xf32>
    %63 = arith.maximumf %61, %62 : vector<8x128xf32>
    %64 = tpu.concatenate %60, %63 in 1 : vector<8x128xf32>, vector<8x128xf32> -> vector<8x256xf32>
    %65 = arith.truncf %64 : vector<8x256xf32> to vector<8x256xbf16>
    %c0_30 = arith.constant 0 : index
    %c0_31 = arith.constant 0 : index
    %c0_32 = arith.constant 0 : index
    %66 = vector.load %arg8[%c0_30, %c0_31, %c0_32] : memref<2x256x128xbf16, #tpu.memory_space<vmem>>, vector<1x256x128xbf16>
    %67 = vector.shape_cast %66 : vector<1x256x128xbf16> to vector<256x128xbf16>
    %cst_33 = arith.constant dense<0.000000e+00> : vector<8x128xf32>
    %68 = tpu.matmul %65, %67, %cst_33 {dimension_numbers = #tpu.dot_dimension_numbers<[1], [0], [0], [1], [0, 0, 1, 1], [], []>} : vector<8x256xbf16>, vector<256x128xbf16>, vector<8x128xf32> -> vector<8x128xf32>
    %c0_34 = arith.constant 0 : index
    %c0_35 = arith.constant 0 : index
    %c0_36 = arith.constant 0 : index
    %69 = vector.load %arg9[%c0_34, %c0_35, %c0_36] : memref<2x1x128xf32, #tpu.memory_space<vmem>>, vector<1x1x128xf32>
    %70 = vector.shape_cast %69 : vector<1x1x128xf32> to vector<1x128xf32>
    %71 = vector.broadcast %70 : vector<1x128xf32> to vector<8x128xf32>
    %72 = arith.addf %68, %71 : vector<8x128xf32>
    %cst_37 = arith.constant 0.000000e+00 : f32
    %73 = vector.broadcast %cst_37 : f32 to vector<8x128xf32>
    %74 = arith.cmpf ogt, %72, %73 : vector<8x128xf32>
    %cst_38 = arith.constant 0.00999999977 : f32
    %75 = vector.broadcast %cst_38 : f32 to vector<8x128xf32>
    %76 = arith.mulf %75, %72 : vector<8x128xf32>
    %77 = arith.select %74, %72, %76 : vector<8x128xi1>, vector<8x128xf32>
    %c0_39 = arith.constant 0 : index
    %c0_40 = arith.constant 0 : index
    %78 = vector.load %arg10[%c0_39, %c0_40] : memref<8x256xf32, #tpu.memory_space<vmem>>, vector<8x128xf32>
    tpu.vector_store %arg10[%c0_39, %c0_40], %77 {strides = array<i32>} : memref<8x256xf32, #tpu.memory_space<vmem>>, vector<8x128xf32>,
    %c1 = arith.constant 1 : index
    %c0_41 = arith.constant 0 : index
    %c0_42 = arith.constant 0 : index
    %79 = vector.load %arg1[%c1, %c0_41, %c0_42] : memref<2x8x40xf32, #tpu.memory_space<vmem>>, vector<1x8x40xf32>
    %80 = vector.shape_cast %79 : vector<1x8x40xf32> to vector<8x40xf32>
    %81 = arith.truncf %80 : vector<8x40xf32> to vector<8x40xbf16>
    %c1_43 = arith.constant 1 : index
    %c0_44 = arith.constant 0 : index
    %c0_45 = arith.constant 0 : index
    %82 = vector.load %arg2[%c1_43, %c0_44, %c0_45] : memref<2x40x704xbf16, #tpu.memory_space<vmem>>, vector<1x40x704xbf16>
    %83 = vector.shape_cast %82 : vector<1x40x704xbf16> to vector<40x704xbf16>
    %cst_46 = arith.constant dense<0.000000e+00> : vector<8x704xf32>
    %84 = tpu.matmul %81, %83, %cst_46 {dimension_numbers = #tpu.dot_dimension_numbers<[1], [0], [0], [1], [0, 0, 1, 1], [], []>} : vector<8x40xbf16>, vector<40x704xbf16>, vector<8x704xf32> -> vector<8x704xf32>
    %c1_47 = arith.constant 1 : index
    %c0_48 = arith.constant 0 : index
    %c0_49 = arith.constant 0 : index
    %85 = vector.load %arg3[%c1_47, %c0_48, %c0_49] : memref<2x1x704xf32, #tpu.memory_space<vmem>>, vector<1x1x704xf32>
    %86 = vector.shape_cast %85 : vector<1x1x704xf32> to vector<1x704xf32>
    %87 = vector.broadcast %86 : vector<1x704xf32> to vector<8x704xf32>
    %88 = arith.addf %84, %87 : vector<8x704xf32>
    %cst_50 = arith.constant 0.000000e+00 : f32
    %89 = vector.broadcast %cst_50 : f32 to vector<8x704xf32>
    %90 = arith.cmpf ogt, %88, %89 : vector<8x704xf32>
    %cst_51 = arith.constant 0.00999999977 : f32
    %91 = vector.broadcast %cst_51 : f32 to vector<8x704xf32>
    %92 = arith.mulf %91, %88 : vector<8x704xf32>
    %93 = arith.select %90, %88, %92 : vector<8x704xi1>, vector<8x704xf32>
    %cst_52 = arith.constant dense<0.000000e+00> : vector<8xf32>
    %94 = vector.multi_reduction <add>, %93, %cst_52 [1] : vector<8x704xf32> to vector<8xf32>
    %95 = vector.shape_cast %94 : vector<8xf32> to vector<8x1xf32>
    %cst_53 = arith.constant 7.040000e+02 : f32
    %96 = vector.broadcast %cst_53 : f32 to vector<8x1xf32>
    %97 = arith.divf %95, %96 : vector<8x1xf32>
    %98 = vector.broadcast %97 : vector<8x1xf32> to vector<8x704xf32>
    %99 = arith.subf %93, %98 : vector<8x704xf32>
    %100 = arith.mulf %99, %99 : vector<8x704xf32>
    %cst_54 = arith.constant dense<0.000000e+00> : vector<8xf32>
    %101 = vector.multi_reduction <add>, %100, %cst_54 [1] : vector<8x704xf32> to vector<8xf32>
    %102 = vector.shape_cast %101 : vector<8xf32> to vector<8x1xf32>
    %cst_55 = arith.constant 7.040000e+02 : f32
    %103 = vector.broadcast %cst_55 : f32 to vector<8x1xf32>
    %104 = arith.divf %102, %103 : vector<8x1xf32>
    %cst_56 = arith.constant 9.99999974E-6 : f32
    %105 = vector.broadcast %cst_56 : f32 to vector<8x1xf32>
    %106 = arith.addf %104, %105 : vector<8x1xf32>
    %107 = math.rsqrt %106 : vector<8x1xf32>
    %108 = vector.broadcast %107 : vector<8x1xf32> to vector<8x704xf32>
    %109 = arith.mulf %99, %108 : vector<8x704xf32>
    %c1_57 = arith.constant 1 : index
    %c0_58 = arith.constant 0 : index
    %c0_59 = arith.constant 0 : index
    %110 = vector.load %arg4[%c1_57, %c0_58, %c0_59] : memref<2x1x704xf32, #tpu.memory_space<vmem>>, vector<1x1x704xf32>
    %111 = vector.shape_cast %110 : vector<1x1x704xf32> to vector<1x704xf32>
    %112 = vector.broadcast %111 : vector<1x704xf32> to vector<8x704xf32>
    %113 = arith.mulf %109, %112 : vector<8x704xf32>
    %c1_60 = arith.constant 1 : index
    %c0_61 = arith.constant 0 : index
    %c0_62 = arith.constant 0 : index
    %114 = vector.load %arg5[%c1_60, %c0_61, %c0_62] : memref<2x1x704xf32, #tpu.memory_space<vmem>>, vector<1x1x704xf32>
    %115 = vector.shape_cast %114 : vector<1x1x704xf32> to vector<1x704xf32>
    %116 = vector.broadcast %115 : vector<1x704xf32> to vector<8x704xf32>
    %117 = arith.addf %113, %116 : vector<8x704xf32>
    %118 = vector.extract_strided_slice %117 {offsets = [0, 64], sizes = [8, 640], strides = [1, 1]} : vector<8x704xf32> to vector<8x640xf32>
    %119 = vector.extract_strided_slice %117 {offsets = [0, 0], sizes = [8, 512], strides = [1, 1]} : vector<8x704xf32> to vector<8x512xf32>
    %120 = vector.extract_strided_slice %118 {offsets = [0, 0], sizes = [8, 512], strides = [1, 1]} : vector<8x640xf32> to vector<8x512xf32>
    %121 = vector.extract_strided_slice %117 {offsets = [0, 128], sizes = [8, 512], strides = [1, 1]} : vector<8x704xf32> to vector<8x512xf32>
    %122 = vector.extract_strided_slice %118 {offsets = [0, 128], sizes = [8, 512], strides = [1, 1]} : vector<8x640xf32> to vector<8x512xf32>
    %123 = tpu.concatenate %119, %120, %121, %122 in 0 : vector<8x512xf32>, vector<8x512xf32>, vector<8x512xf32>, vector<8x512xf32> -> vector<32x512xf32>
    %124 = arith.truncf %123 : vector<32x512xf32> to vector<32x512xbf16>
    %c1_63 = arith.constant 1 : index
    %c0_64 = arith.constant 0 : index
    %c0_65 = arith.constant 0 : index
    %125 = vector.load %arg6[%c1_63, %c0_64, %c0_65] : memref<2x512x128xbf16, #tpu.memory_space<vmem>>, vector<1x512x128xbf16>
    %126 = vector.shape_cast %125 : vector<1x512x128xbf16> to vector<512x128xbf16>
    %cst_66 = arith.constant dense<0.000000e+00> : vector<32x128xf32>
    %127 = tpu.matmul %124, %126, %cst_66 {dimension_numbers = #tpu.dot_dimension_numbers<[1], [0], [0], [1], [0, 0, 1, 1], [], []>} : vector<32x512xbf16>, vector<512x128xbf16>, vector<32x128xf32> -> vector<32x128xf32>
    %c1_67 = arith.constant 1 : index
    %c0_68 = arith.constant 0 : index
    %c0_69 = arith.constant 0 : index
    %128 = vector.load %arg7[%c1_67, %c0_68, %c0_69] : memref<2x1x128xf32, #tpu.memory_space<vmem>>, vector<1x1x128xf32>
    %129 = vector.shape_cast %128 : vector<1x1x128xf32> to vector<1x128xf32>
    %130 = vector.broadcast %129 : vector<1x128xf32> to vector<32x128xf32>
    %131 = arith.addf %127, %130 : vector<32x128xf32>
    %cst_70 = arith.constant 0.000000e+00 : f32
    %132 = vector.broadcast %cst_70 : f32 to vector<32x128xf32>
    %133 = arith.cmpf ogt, %131, %132 : vector<32x128xf32>
    %cst_71 = arith.constant 0.00999999977 : f32
    %134 = vector.broadcast %cst_71 : f32 to vector<32x128xf32>
    %135 = arith.mulf %134, %131 : vector<32x128xf32>
    %136 = arith.select %133, %131, %135 : vector<32x128xi1>, vector<32x128xf32>
    %137 = vector.extract_strided_slice %136 {offsets = [0, 0], sizes = [8, 128], strides = [1, 1]} : vector<32x128xf32> to vector<8x128xf32>
    %138 = vector.extract_strided_slice %136 {offsets = [8, 0], sizes = [8, 128], strides = [1, 1]} : vector<32x128xf32> to vector<8x128xf32>
    %139 = arith.maximumf %137, %138 : vector<8x128xf32>
    %140 = vector.extract_strided_slice %136 {offsets = [16, 0], sizes = [8, 128], strides = [1, 1]} : vector<32x128xf32> to vector<8x128xf32>
    %141 = vector.extract_strided_slice %136 {offsets = [24, 0], sizes = [8, 128], strides = [1, 1]} : vector<32x128xf32> to vector<8x128xf32>
    %142 = arith.maximumf %140, %141 : vector<8x128xf32>
    %143 = tpu.concatenate %139, %142 in 1 : vector<8x128xf32>, vector<8x128xf32> -> vector<8x256xf32>
    %144 = arith.truncf %143 : vector<8x256xf32> to vector<8x256xbf16>
    %c1_72 = arith.constant 1 : index
    %c0_73 = arith.constant 0 : index
    %c0_74 = arith.constant 0 : index
    %145 = vector.load %arg8[%c1_72, %c0_73, %c0_74] : memref<2x256x128xbf16, #tpu.memory_space<vmem>>, vector<1x256x128xbf16>
    %146 = vector.shape_cast %145 : vector<1x256x128xbf16> to vector<256x128xbf16>
    %cst_75 = arith.constant dense<0.000000e+00> : vector<8x128xf32>
    %147 = tpu.matmul %144, %146, %cst_75 {dimension_numbers = #tpu.dot_dimension_numbers<[1], [0], [0], [1], [0, 0, 1, 1], [], []>} : vector<8x256xbf16>, vector<256x128xbf16>, vector<8x128xf32> -> vector<8x128xf32>
    %c1_76 = arith.constant 1 : index
    %c0_77 = arith.constant 0 : index
    %c0_78 = arith.constant 0 : index
    %148 = vector.load %arg9[%c1_76, %c0_77, %c0_78] : memref<2x1x128xf32, #tpu.memory_space<vmem>>, vector<1x1x128xf32>
    %149 = vector.shape_cast %148 : vector<1x1x128xf32> to vector<1x128xf32>
    %150 = vector.broadcast %149 : vector<1x128xf32> to vector<8x128xf32>
    %151 = arith.addf %147, %150 : vector<8x128xf32>
    %cst_79 = arith.constant 0.000000e+00 : f32
    %152 = vector.broadcast %cst_79 : f32 to vector<8x128xf32>
    %153 = arith.cmpf ogt, %151, %152 : vector<8x128xf32>
    %cst_80 = arith.constant 0.00999999977 : f32
    %154 = vector.broadcast %cst_80 : f32 to vector<8x128xf32>
    %155 = arith.mulf %154, %151 : vector<8x128xf32>
    %156 = arith.select %153, %151, %155 : vector<8x128xi1>, vector<8x128xf32>
    %c0_81 = arith.constant 0 : index
    %c128 = arith.constant 128 : index
    %157 = vector.load %arg10[%c0_81, %c128] : memref<8x256xf32, #tpu.memory_space<vmem>>, vector<8x128xf32>
    tpu.vector_store %arg10[%c0_81, %c128], %156 {strides = array<i32>} : memref<8x256xf32, #tpu.memory_space<vmem>>, vector<8x128xf32>,
    return
  }
  func.func @transform_0(%arg0: i32) -> (i32, i32, i32) {
    %c0_i32 = arith.constant 0 : i32
    %c0_i32_0 = arith.constant 0 : i32
    %c0_i32_1 = arith.constant 0 : i32
    return %arg0, %c0_i32, %c0_i32_0 : i32, i32, i32
  }
  func.func @transform_1(%arg0: i32) -> (i32, i32, i32) {
    %c0_i32 = arith.constant 0 : i32
    %c0_i32_0 = arith.constant 0 : i32
    %c0_i32_1 = arith.constant 0 : i32
    return %arg0, %c0_i32, %c0_i32_0 : i32, i32, i32
  }
  func.func @transform_2(%arg0: i32) -> (i32, i32, i32) {
    %c0_i32 = arith.constant 0 : i32
    %c0_i32_0 = arith.constant 0 : i32
    %c0_i32_1 = arith.constant 0 : i32
    return %arg0, %c0_i32, %c0_i32_0 : i32, i32, i32
  }
  func.func @transform_3(%arg0: i32) -> (i32, i32, i32) {
    %c0_i32 = arith.constant 0 : i32
    %c0_i32_0 = arith.constant 0 : i32
    %c0_i32_1 = arith.constant 0 : i32
    return %arg0, %c0_i32, %c0_i32_0 : i32, i32, i32
  }
  func.func @transform_4(%arg0: i32) -> (i32, i32, i32) {
    %c0_i32 = arith.constant 0 : i32
    %c0_i32_0 = arith.constant 0 : i32
    %c0_i32_1 = arith.constant 0 : i32
    return %arg0, %c0_i32, %c0_i32_0 : i32, i32, i32
  }
  func.func @transform_5(%arg0: i32) -> (i32, i32, i32) {
    %c0_i32 = arith.constant 0 : i32
    %c0_i32_0 = arith.constant 0 : i32
    %c0_i32_1 = arith.constant 0 : i32
    return %arg0, %c0_i32, %c0_i32_0 : i32, i32, i32
  }
  func.func @transform_6(%arg0: i32) -> (i32, i32, i32) {
    %c0_i32 = arith.constant 0 : i32
    %c0_i32_0 = arith.constant 0 : i32
    %c0_i32_1 = arith.constant 0 : i32
    return %arg0, %c0_i32, %c0_i32_0 : i32, i32, i32
  }
  func.func @transform_7(%arg0: i32) -> (i32, i32, i32) {
    %c0_i32 = arith.constant 0 : i32
    %c0_i32_0 = arith.constant 0 : i32
    %c0_i32_1 = arith.constant 0 : i32
    return %arg0, %c0_i32, %c0_i32_0 : i32, i32, i32
  }
  func.func @transform_8(%arg0: i32) -> (i32, i32, i32) {
    %c0_i32 = arith.constant 0 : i32
    %c0_i32_0 = arith.constant 0 : i32
    %c0_i32_1 = arith.constant 0 : i32
    return %arg0, %c0_i32, %c0_i32_0 : i32, i32, i32
  }
  func.func @transform_9(%arg0: i32) -> (i32, i32) {
    %c0_i32 = arith.constant 0 : i32
    %c0_i32_0 = arith.constant 0 : i32
    return %c0_i32, %arg0 : i32, i32
  }
}

</mosaic_0001>

<bundles_post_ra>
// kernel: tpu_custom_call.1
= control target key start
LH: loop header
LB: loop body
LE: loop exit
PB: predicated region body
PF: predicated region fallthrough
CT: control target
= control target key end

     0   :  { %s4690_s0 = inlined_call_operand.hbm [shape: f32[4,8,40], index: 0, kind: input, shape index: {}]   ;;  %s4691_s1 = inlined_call_operand.hbm [shape: bf16[4,40,704], index: 1, kind: input, shape index: {}]   ;;  %s4692_s2 = inlined_call_operand.hbm [shape: f32[4,1,704], index: 2, kind: input, shape index: {}]   ;;  %s4693_s3 = inlined_call_operand.hbm [shape: f32[4,1,704], index: 3, kind: input, shape index: {}]   ;;  %s4694_s4 = inlined_call_operand.hbm [shape: f32[4,1,704], index: 4, kind: input, shape index: {}]   ;;  %s4695_s5 = inlined_call_operand.hbm [shape: bf16[4,512,128], index: 5, kind: input, shape index: {}]   ;;  %s4696_s6 = inlined_call_operand.vmem [shape: f32[4,1,128], index: 6, kind: input, shape index: {}]   ;;  %s4697_s7 = inlined_call_operand.hbm [shape: bf16[4,256,128], index: 7, kind: input, shape index: {}]   ;;  %s4698_s8 = inlined_call_operand.vmem [shape: f32[4,1,128], index: 8, kind: input, shape index: {}]   ;;  %s4699_s9 = inlined_call_operand.hbm [shape: f32[8,512], index: 9, kind: output, shape index: {}]  }
   0x1   :  { %4716 = sst [smem:[#allocation26_spill]] %s4691_s1 }
   0x2   :  { %4717 = sst [smem:[#allocation27_spill]] %s4693_s3 }
   0x3   :  { %4718 = sst [smem:[#allocation28_spill]] %s4698_s8 }
   0x4   :  { %4719 = sst [smem:[#allocation29_spill]] %s4699_s9 }
   0x5   :  { %14 = vsyncpa [#allocation3], 0 }
   0x6   :  { %16 = vsyncpa [#allocation3 + $0x1], 0 }
   0x7   :  { %17 = vsyncpa [#allocation6], 0 }
   0x8   :  { %19 = vsyncpa [#allocation6 + $0x1], 0 }
   0x9   :  { %20 = vsyncpa [#allocation9], 0 }
   0xa   :  { %22 = vsyncpa [#allocation9 + $0x1], 0 }
   0xb   :  { %23 = vsyncpa [#allocation12], 0 }
   0xc   :  { %25 = vsyncpa [#allocation12 + $0x1], 0 }
   0xd   :  { %26 = vsyncpa [#allocation4], 0 }
   0xe   :  { %28 = vsyncpa [#allocation4 + $0x1], 0  ;;  %s3945_s30 = smov 0   ;;  %s3947_s10 = smov 0  }
   0xf   :  { %s3949_s11 = smov 0   ;;  %s3951_s12 = smov 0  }
  0x10 LB: > { %4720 = sst [smem:[#allocation20_spill]] %s3863_s30  ;;  %s3966_s13 = sadd.s32 4294967295, %s3875_s12   ;;  %s3875_s12 = sphi %s3951_s12, %s4752_s12   ;;  %s3871_s11 = sphi %s3949_s11, %s4754_s11   ;;  %s3867_s10 = sphi %s3947_s10, %s4756_s10   ;;  %s3863_s30 = sphi %s3945_s30, %s4755_s30  }
  0x11   : > { %4721 = sst [smem:[#allocation21_spill]] %s3871_s11  ;;  %s2858_s14 = sadd.s32 4294967294, %s3875_s12  }
  0x12   : > { %s3970_s15 = sadd.s32 1, %s3875_s12   ;;  %s41_s16 = sadd.s32 1, %s3871_s11 }
  0x13   : > { %4722 = sst [smem:[#allocation22_spill]] %s3970_s15  ;;  %s38_s17 = ssub.s32 %s3875_s12, %s3970_s15 }
  0x14   : > { %p48_p0 = scmp.ne.s32.totalorder %s3871_s11, %s3867_s10  ;;  %p39_p1 = scmp.eq.s32.totalorder %s38_s17, 0 }
  0x15   : > { %p49_p2 = scmp.eq.s32.totalorder %s3875_s12, 0  ;;  %p54_p3 = scmp.ne.s32.totalorder %s3867_s10, %s3863_s30 }
  0x16   : > { %p55_p4 = scmp.eq.s32.totalorder %s3966_s13, 0  ;;  %p286_p7 = scmp.eq.s32.totalorder %s3966_s13, 1 }
  0x17   : > { %s3982_s18 = scalar_select %p39_p1, %s3871_s11, %s41_s16  }
  0x18   : > { %p50_p5 = por %p49_p2, %p48_p0  ;;  %p3984_p6 = por %p55_p4, %p54_p3 }
  0x19   : > { %4723 = sst [smem:[#allocation23_spill]] %s3982_s18  ;;  %p292_p8 = scmp.eq.s32.totalorder %s2858_s14, 1 }
  0x1a   : > { %s4724_s19 = scalar_select %p3984_p6, 1, 0 }
  0x1b   : > { %p3375_p10 = scmp.lt.s32.totalorder %s3875_s12, 2  ;;  %p3991_p11 = por %p286_p7, %p48_p0 }
  0x1c   : > { %p3995_p12 = por %p292_p8, %p54_p3  ;;  %s4000_s22 = sand.u32 1, %s3871_s11  }
  0x1d   : > { %s4725_s20 = scalar_select %p3991_p11, 1, 0 }
  0x1e   : > { %s4727_s21 = scalar_select %p3995_p12, 1, 0 }
  0x1f   : > { %4726 = sst [smem:[#allocation24_spill]] %s4725_s20  ;;  %p4002_p13 = pnand %p3375_p10, %p50_p5 }
  0x20   : > { %4728 = sst [smem:[#allocation25_spill]] %s4727_s21  ;;  %s4007_s24 = sand.u32 1, %s3875_s12  }
  0x21   : > { %s3323_s25 = smul.u32 240, %s4000_s22  ;;  %s4730_s1 = sld [smem:[#allocation26_spill]] }
  0x22   : > { %s3324_s26 = smul.u32 3840, %s3875_s12  ;;  %p4024_p2 = pneg %p4002_p13 }
  0x23   : > { %s337_s27 = scalar_lea.vmem [#allocation5], %s3323_s25 }
  0x24   : > { %s345_s28 = sshll.u32 %s337_s27, 4  ;;  %s4016_s28 = int_to_ptr.vmem [resolvable:$true] %s345_s28 }
  0x27   : > { %s4014_s16 = scalar_lea.hbm %s4730_s1, %s3324_s26  ;;  %s3592_s27 = scalar_lea.hbm %s4730_s1, 7680 }
  0x28   : > { %s3587_s18 = scalar_lea.hbm %s4014_s16, 3840  ;;  %p3593_p5 = scmp.lt.u32.totalorder %s4014_s16, %s4730_s1 }
  0x29   : > { %p3588_p1 = scmp.ne.s32.totalorder %s4014_s16, %s3587_s18  ;;  %p3594_p7 = scmp.lt.u32.totalorder %s3592_s27, %s3587_s18 }
  0x2a   : > { %p3596_p10 = scmp.lt.u32.totalorder %s3587_s18, %s4014_s16 }
  0x2b   : > { %p3590_p3 = pnand %p4024_p2, %p3588_p1  ;;  %p3595_p8 = por %p3594_p7, %p3593_p5 }
  0x2d   : > { %p3591_p4 = pneg %p3590_p3  ;;  %p3597_p9 = por %p3596_p10, %p3595_p8 }
  0x2f   : > { %p3598_p0 = pnand %p3597_p9, %p3591_p4 }
  0x31   : > { %3601 = shalt.err (!%p3598_p0)
}
  0x32   : > { %s3602_s17 = scalar_lea.vmem %s4016_s28, 3840  ;;  %s3877_s25 = smov [#allocation5]  }
  0x33   : > { %p3603_p1 = scmp.ne.s32.totalorder %s4016_s28, %s3602_s17  ;;  %s3607_s26 = sshll.u32 %s3877_s25, 4  ;;  %s3608_s26 = int_to_ptr.vmem [resolvable:$false] %s3607_s26 }
  0x34   : > { %s3609_s29 = scalar_lea.vmem %s3608_s26, 7680  ;;  %p3610_p11 = scmp.lt.s32.totalorder %s4016_s28, %s3608_s26 }
  0x35   : > { %p3605_p3 = pnand %p3603_p1, %p4024_p2  ;;  %p3611_p6 = scmp.lt.s32.totalorder %s3609_s29, %s3602_s17 }
  0x37   : > { %p3606_p12 = pneg %p3605_p3  ;;  %p3612_p5 = por %p3611_p6, %p3610_p11 }
  0x39   : > { %p3613_p7 = pnand %p3612_p5, %p3606_p12 }
  0x3b   : > { %3616 = shalt.err (!%p3613_p7)
}
  0x3c   : > { %s3878_s18 = smov 384   ;;  %s3879_s27 = smov 24  }
  0x3d   : > { %s4732_s14 = scalar_lea.sflag [#allocation6], %s4007_s24  ;;  %p479_p9 = scmp.lt.s32.totalorder %s3875_s12, 3 }
  0x3e   : > { %3355 = dma.hbm_to_vmem [thread:$0]  (!%p4002_p13), %s4014_s16, 3840, %s4016_s28, %s4732_s14, %s3878_s18, %s3878_s18, %s3879_s27  }
  0x3f   : > { %s4051_s17 = smul.u32 12, %s4000_s22  ;;  %p4733_p6 = scmp.ge.s32.totalorder %s3875_s12, 1 }
  0x40   : > { %s4054_s25 = smul.u32 192, %s3875_s12  ;;  %s4735_s3 = sld [smem:[#allocation27_spill]] }
  0x41   : > { %p4058_p11 = pnand %p4733_p6, %p479_p9  ;;  %s381_s28 = scalar_lea.vmem [#allocation8], %s4051_s17 }
  0x42   : > { %s389_s16 = sshll.u32 %s381_s28, 4  ;;  %s4710_s18 = scalar_lea.sflag [#allocation9], %s4007_s24  ;;  %s4069_s16 = int_to_ptr.vmem [resolvable:$true] %s389_s16 }
  0x43   : > { %s4734_s26 = scalar_select %p4058_p11, 1, 0 }
  0x46   : > { %s4066_s15 = scalar_lea.hbm %s4735_s3, %s4054_s25  ;;  %s3622_s1 = scalar_lea.hbm %s4735_s3, 384 }
  0x47   : > { %s3617_s27 = scalar_lea.hbm %s4066_s15, 192  ;;  %p3623_p8 = scmp.lt.u32.totalorder %s4066_s15, %s4735_s3 }
  0x48   : > { %p3618_p12 = scmp.ne.s32.totalorder %s4066_s15, %s3617_s27  ;;  %p3624_p10 = scmp.lt.u32.totalorder %s3622_s1, %s3617_s27 }
  0x49   : > { %p3626_p3 = scmp.lt.u32.totalorder %s3617_s27, %s4066_s15 }
  0x4a   : > { %p3620_p0 = pnand %p3618_p12, %p4024_p2  ;;  %p3625_p1 = por %p3624_p10, %p3623_p8 }
  0x4c   : > { %p3621_p4 = pneg %p3620_p0  ;;  %p3627_p5 = por %p3626_p3, %p3625_p1 }
  0x4e   : > { %p3628_p7 = pnand %p3627_p5, %p3621_p4 }
  0x50   : > { %3631 = shalt.err (!%p3628_p7)
}
  0x51   : > { %s3632_s28 = scalar_lea.vmem %s4069_s16, 192  ;;  %s3880_s21 = smov [#allocation8]  }
  0x52   : > { %p3633_p9 = scmp.ne.s32.totalorder %s4069_s16, %s3632_s28  ;;  %s3637_s14 = sshll.u32 %s3880_s21, 4  ;;  %s3638_s14 = int_to_ptr.vmem [resolvable:$false] %s3637_s14 }
  0x53   : > { %s3639_s30 = scalar_lea.vmem %s3638_s14, 384  ;;  %p3640_p0 = scmp.lt.s32.totalorder %s4069_s16, %s3638_s14 }
  0x54   : > { %p3635_p6 = pnand %p3633_p9, %p4024_p2  ;;  %p3641_p11 = scmp.lt.s32.totalorder %s3639_s30, %s3632_s28 }
  0x56   : > { %p3636_p12 = pneg %p3635_p6  ;;  %p3642_p8 = por %p3641_p11, %p3640_p0 }
  0x58   : > { %p3643_p10 = pnand %p3642_p8, %p3636_p12 }
  0x5a   : > { %3646 = shalt.err (!%p3643_p10)
}
  0x5b   : > { %s4711_s27 = smov 96   ;;  %s4713_s1 = smov 6  }
  0x5c   : > { %3361 = dma.hbm_to_vmem [thread:$0]  (!%p4002_p13), %s4066_s15, 192, %s4069_s16, %s4710_s18, %s4711_s27, %s4711_s27, %s4713_s1  }
  0x5d   : > { %s2876_s29 = sshll.u32 %s4000_s22, 9  ;;  %s3163_s28 = sshll.u32 %s3875_s12, 13 }
  0x5e   : > { %s4103_s30 = scalar_lea.hbm %s4695_s5, %s3163_s28  ;;  %s425_s3 = scalar_lea.vmem [#allocation11], %s2876_s29 }
  0x5f   : > { %s433_s9 = sshll.u32 %s425_s3, 4  ;;  %s4715_s20 = scalar_lea.sflag [#allocation12], %s4007_s24  ;;  %s4105_s9 = int_to_ptr.vmem [resolvable:$true] %s433_s9 }
  0x60   : > { %s3647_s8 = scalar_lea.hbm %s4103_s30, 8192  ;;  %s3652_s21 = scalar_lea.hbm %s4695_s5, 16384 }
  0x61   : > { %p3648_p11 = scmp.ne.s32.totalorder %s4103_s30, %s3647_s8  ;;  %p3653_p3 = scmp.lt.u32.totalorder %s4103_s30, %s4695_s5 }
  0x62   : > { %p3654_p5 = scmp.lt.u32.totalorder %s3652_s21, %s3647_s8  ;;  %p3656_p9 = scmp.lt.u32.totalorder %s3647_s8, %s4103_s30 }
  0x63   : > { %p3650_p4 = pnand %p3648_p11, %p4024_p2 }
  0x64   : > { %p3655_p7 = por %p3654_p5, %p3653_p3 }
  0x65   : > { %p3651_p1 = pneg %p3650_p4 }
  0x66   : > { %p3657_p6 = por %p3656_p9, %p3655_p7 }
  0x68   : > { %p3658_p12 = pnand %p3657_p6, %p3651_p1 }
  0x6a   : > { %3661 = shalt.err (!%p3658_p12)
}
  0x6b   : > { %s3662_s3 = scalar_lea.vmem %s4105_s9, 8192  ;;  %s3883_s29 = smov [#allocation11]  }
  0x6c   : > { %p3663_p0 = scmp.ne.s32.totalorder %s4105_s9, %s3662_s3  ;;  %s3667_s15 = sshll.u32 %s3883_s29, 4  ;;  %s3668_s15 = int_to_ptr.vmem [resolvable:$false] %s3667_s15 }
  0x6d   : > { %s3669_s16 = scalar_lea.vmem %s3668_s15, 16384  ;;  %p3670_p11 = scmp.lt.s32.totalorder %s4105_s9, %s3668_s15 }
  0x6e   : > { %p3665_p8 = pnand %p3663_p0, %p4024_p2  ;;  %p3671_p4 = scmp.lt.s32.totalorder %s3669_s16, %s3662_s3 }
  0x70   : > { %p3666_p10 = pneg %p3665_p8  ;;  %p3672_p3 = por %p3671_p4, %p3670_p11 }
  0x72   : > { %p3673_p5 = pnand %p3672_p3, %p3666_p10 }
  0x74   : > { %3676 = shalt.err (!%p3673_p5)
}
  0x75   : > { %s3884_s8 = smov 64   ;;  %s3885_s21 = smov 4  }
  0x76   : > { %3367 = dma.hbm_to_vmem [thread:$0]  (!%p4002_p13), %s4103_s30, 8192, %s4105_s9, %s4715_s20, %s3884_s8, %s3884_s8, %s3885_s21  }
  0x77   : > { %s2861_s28 = sshll.u32 %s4000_s22, 4  ;;  %s3161_s14 = sshll.u32 %s3875_s12, 8 }
  0x78   : > { %s4139_s15 = scalar_lea.hbm %s4690_s0, %s3161_s14  ;;  %s316_s16 = scalar_lea.vmem [#allocation2], %s2861_s28 }
  0x79   : > { %s323_s18 = sshll.u32 %s316_s16, 4  ;;  %s313_s27 = scalar_lea.sflag [#allocation3], %s4000_s22  ;;  %s4141_s18 = int_to_ptr.vmem [resolvable:$true] %s323_s18 }
  0x7a   : > { %s3677_s1 = scalar_lea.hbm %s4139_s15, 256  ;;  %s3682_s3 = scalar_lea.hbm %s4690_s0, 512 }
  0x7b   : > { %p3678_p1 = scmp.ne.s32.totalorder %s4139_s15, %s3677_s1  ;;  %p3683_p6 = scmp.lt.u32.totalorder %s4139_s15, %s4690_s0 }
  0x7c   : > { %p3684_p12 = scmp.lt.u32.totalorder %s3682_s3, %s3677_s1  ;;  %p3686_p8 = scmp.lt.u32.totalorder %s3677_s1, %s4139_s15 }
  0x7d   : > { %p3680_p7 = pnand %p3678_p1, %p4024_p2 }
  0x7e   : > { %p3685_p0 = por %p3684_p12, %p3683_p6 }
  0x7f   : > { %p3681_p9 = pneg %p3680_p7 }
  0x80   : > { %p3687_p10 = por %p3686_p8, %p3685_p0 }
  0x82   : > { %p3688_p11 = pnand %p3687_p10, %p3681_p9 }
  0x84   : > { %3691 = shalt.err (!%p3688_p11)
}
  0x85   : > { %s3692_s28 = scalar_lea.vmem %s4141_s18, 256  ;;  %s3886_s16 = smov [#allocation2]  }
  0x86   : > { %p3693_p4 = scmp.ne.s32.totalorder %s4141_s18, %s3692_s28  ;;  %s3697_s9 = sshll.u32 %s3886_s16, 4  ;;  %s3698_s9 = int_to_ptr.vmem [resolvable:$false] %s3697_s9 }
  0x87   : > { %s3699_s30 = scalar_lea.vmem %s3698_s9, 512  ;;  %p3700_p1 = scmp.lt.s32.totalorder %s4141_s18, %s3698_s9 }
  0x88   : > { %p3695_p3 = pnand %p3693_p4, %p4024_p2  ;;  %p3701_p7 = scmp.lt.s32.totalorder %s3699_s30, %s3692_s28 }
  0x8a   : > { %p3696_p5 = pneg %p3695_p3  ;;  %p3702_p6 = por %p3701_p7, %p3700_p1 }
  0x8c   : > { %p3703_p12 = pnand %p3702_p6, %p3696_p5 }
  0x8e   : > { %3706 = shalt.err (!%p3703_p12)
}
  0x8f   : > { %s3887_s1 = smov 128   ;;  %s3888_s3 = smov 8  }
  0x90   : > { %3352 = dma.hbm_to_vmem [thread:$0]  (!%p4002_p13), %s4139_s15, 256, %s4141_s18, %s313_s27, %s3887_s1, %s3887_s1, %s3888_s3  }
  0x91   : > { %s4171_s16 = scalar_lea.hbm %s4692_s2, %s4054_s25  ;;  %s359_s28 = scalar_lea.vmem [#allocation7], %s4051_s17 }
  0x92   : > { %s367_s9 = sshll.u32 %s359_s28, 4  ;;  %s3707_s30 = scalar_lea.hbm %s4171_s16, 192  ;;  %s4174_s9 = int_to_ptr.vmem [resolvable:$true] %s367_s9 }
  0x93   : > { %p3708_p9 = scmp.ne.s32.totalorder %s4171_s16, %s3707_s30  ;;  %s3712_s27 = scalar_lea.hbm %s4692_s2, 384 }
  0x94   : > { %p3713_p10 = scmp.lt.u32.totalorder %s4171_s16, %s4692_s2  ;;  %p3714_p11 = scmp.lt.u32.totalorder %s3712_s27, %s3707_s30 }
  0x95   : > { %p3710_p0 = pnand %p3708_p9, %p4024_p2  ;;  %p3716_p3 = scmp.lt.u32.totalorder %s3707_s30, %s4171_s16 }
  0x96   : > { %p3715_p4 = por %p3714_p11, %p3713_p10 }
  0x97   : > { %p3711_p8 = pneg %p3710_p0 }
  0x98   : > { %p3717_p5 = por %p3716_p3, %p3715_p4 }
  0x9a   : > { %p3718_p1 = pnand %p3717_p5, %p3711_p8 }
  0x9c   : > { %3721 = shalt.err (!%p3718_p1)
}
  0x9d   : > { %s3722_s3 = scalar_lea.vmem %s4174_s9, 192  ;;  %s3889_s20 = smov [#allocation7]  }
  0x9e   : > { %p3723_p7 = scmp.ne.s32.totalorder %s4174_s9, %s3722_s3  ;;  %s3727_s14 = sshll.u32 %s3889_s20, 4  ;;  %s3728_s14 = int_to_ptr.vmem [resolvable:$false] %s3727_s14 }
  0x9f   : > { %s3729_s29 = scalar_lea.vmem %s3728_s14, 384  ;;  %p3730_p9 = scmp.lt.s32.totalorder %s4174_s9, %s3728_s14 }
  0xa0   : > { %p3725_p6 = pnand %p3723_p7, %p4024_p2  ;;  %p3731_p0 = scmp.lt.s32.totalorder %s3729_s29, %s3722_s3 }
  0xa2   : > { %p3726_p12 = pneg %p3725_p6  ;;  %p3732_p10 = por %p3731_p0, %p3730_p9 }
  0xa4   : > { %p3733_p11 = pnand %p3732_p10, %p3726_p12 }
  0xa6   : > { %3736 = shalt.err (!%p3733_p11)
}
  0xa7   : > { %s4736_s28 = smov 6   ;;  %s4737_s30 = smov 96  }
  0xa8   : > { %s4738_s18 = scalar_lea.sflag [#allocation6], %s4007_s24  ;;  %s4206_s1 = scalar_lea.hbm %s4694_s4, %s4054_s25 }
  0xa9   : > { %3358 = dma.hbm_to_vmem [thread:$0]  (!%p4002_p13), %s4171_s16, 192, %s4174_s9, %s4738_s18, %s4737_s30, %s4737_s30, %s4736_s28  }
  0xaa   : > { %s403_s3 = scalar_lea.vmem [#allocation10], %s4051_s17  ;;  %s2880_s14 = sshll.u32 %s4000_s22, 8 }
  0xab   : > { %s411_s20 = sshll.u32 %s403_s3, 4  ;;  %s3737_s29 = scalar_lea.hbm %s4206_s1, 192  ;;  %s4209_s20 = int_to_ptr.vmem [resolvable:$true] %s411_s20 }
  0xac   : > { %p3738_p8 = scmp.ne.s32.totalorder %s4206_s1, %s3737_s29  ;;  %s3742_s18 = scalar_lea.hbm %s4694_s4, 384 }
  0xad   : > { %p3743_p5 = scmp.lt.u32.totalorder %s4206_s1, %s4694_s4  ;;  %p3744_p1 = scmp.lt.u32.totalorder %s3742_s18, %s3737_s29 }
  0xae   : > { %p3740_p4 = pnand %p3738_p8, %p4024_p2  ;;  %p3746_p6 = scmp.lt.u32.totalorder %s3737_s29, %s4206_s1 }
  0xaf   : > { %p3745_p7 = por %p3744_p1, %p3743_p5 }
  0xb0   : > { %p3741_p3 = pneg %p3740_p4 }
  0xb1   : > { %p3747_p12 = por %p3746_p6, %p3745_p7 }
  0xb3   : > { %p3748_p9 = pnand %p3747_p12, %p3741_p3 }
  0xb5   : > { %3751 = shalt.err (!%p3748_p9)
}
  0xb6   : > { %s3752_s17 = scalar_lea.vmem %s4209_s20, 192  ;;  %s3890_s15 = smov [#allocation10]  }
  0xb7   : > { %p3753_p0 = scmp.ne.s32.totalorder %s4209_s20, %s3752_s17  ;;  %s3757_s3 = sshll.u32 %s3890_s15, 4  ;;  %s3758_s3 = int_to_ptr.vmem [resolvable:$false] %s3757_s3 }
  0xb8   : > { %s3759_s16 = scalar_lea.vmem %s3758_s3, 384  ;;  %p3760_p8 = scmp.lt.s32.totalorder %s4209_s20, %s3758_s3 }
  0xb9   : > { %p3755_p10 = pnand %p3753_p0, %p4024_p2  ;;  %p3761_p4 = scmp.lt.s32.totalorder %s3759_s16, %s3752_s17 }
  0xbb   : > { %p3756_p11 = pneg %p3755_p10  ;;  %p3762_p5 = por %p3761_p4, %p3760_p8 }
  0xbd   : > { %p3763_p1 = pnand %p3762_p5, %p3756_p11 }
  0xbf   : > { %3766 = shalt.err (!%p3763_p1)
}
  0xc0   : > { %s4739_s29 = scalar_lea.sflag [#allocation9], %s4007_s24  ;;  %s3165_s9 = sshll.u32 %s3875_s12, 12 }
  0xc1   : > { %3364 = dma.hbm_to_vmem [thread:$0]  (!%p4002_p13), %s4206_s1, 192, %s4209_s20, %s4739_s29, %s4737_s30, %s4737_s30, %s4736_s28  }
  0xc2   : > { %s4242_s27 = scalar_lea.hbm %s4697_s7, %s3165_s9  ;;  %s455_s17 = scalar_lea.vmem [#allocation13], %s2880_s14 }
  0xc3   : > { %s463_s15 = sshll.u32 %s455_s17, 4  ;;  %s3767_s3 = scalar_lea.hbm %s4242_s27, 4096  ;;  %s4246_s15 = int_to_ptr.vmem [resolvable:$true] %s463_s15 }
  0xc4   : > { %p3768_p3 = scmp.ne.s32.totalorder %s4242_s27, %s3767_s3  ;;  %s3772_s1 = scalar_lea.hbm %s4697_s7, 8192 }
  0xc5   : > { %p3773_p12 = scmp.lt.u32.totalorder %s4242_s27, %s4697_s7  ;;  %p3774_p9 = scmp.lt.u32.totalorder %s3772_s1, %s3767_s3 }
  0xc6   : > { %p3770_p7 = pnand %p3768_p3, %p4024_p2  ;;  %p3776_p10 = scmp.lt.u32.totalorder %s3767_s3, %s4242_s27 }
  0xc7   : > { %p3775_p0 = por %p3774_p9, %p3773_p12 }
  0xc8   : > { %p3771_p6 = pneg %p3770_p7 }
  0xc9   : > { %p3777_p11 = por %p3776_p10, %p3775_p0 }
  0xcb   : > { %p3778_p8 = pnand %p3777_p11, %p3771_p6 }
  0xcd   : > { %3781 = shalt.err (!%p3778_p8)
}
  0xce   : > { %s3782_s22 = scalar_lea.vmem %s4246_s15, 4096  ;;  %s3891_s14 = smov [#allocation13]  }
  0xcf   : > { %p3783_p4 = scmp.ne.s32.totalorder %s4246_s15, %s3782_s22  ;;  %s3787_s29 = sshll.u32 %s3891_s14, 4  ;;  %s3788_s29 = int_to_ptr.vmem [resolvable:$false] %s3787_s29 }
  0xd0   : > { %s3789_s9 = scalar_lea.vmem %s3788_s29, 8192  ;;  %p3790_p3 = scmp.lt.s32.totalorder %s4246_s15, %s3788_s29 }
  0xd1   : > { %p3785_p5 = pnand %p3783_p4, %p4024_p2  ;;  %p3791_p7 = scmp.lt.s32.totalorder %s3789_s9, %s3782_s22 }
  0xd3   : > { %p3786_p1 = pneg %p3785_p5  ;;  %p3792_p12 = por %p3791_p7, %p3790_p3 }
  0xd5   : > { %p3793_p9 = pnand %p3792_p12, %p3786_p1 }
  0xd7   : > { %3796 = shalt.err (!%p3793_p9)
}
  0xd8   : > { %s4740_s18 = scalar_lea.sflag [#allocation12], %s4007_s24  ;;  %p4741_p2 = scmp.ne.s32.totalorder %s4734_s26, 0 }
  0xd9   : > { %3370 = dma.hbm_to_vmem [thread:$0]  (!%p4002_p13), %s4242_s27, 4096, %s4246_s15, %s4740_s18, %s3884_s8, %s3884_s8, %s3885_s21  }
  0xda   : > { %483 = sbr.rel (%p4741_p2) target bundleno = 2320 (0x910), region = 56  ;;  %s4277_s11 = sand.u32 (!%p4741_p2), 1, %s3867_s10  }
  0xdb   : > { %s2885_s25 = sshll.u32 (!%p4741_p2), %s4277_s11, 4  ;;  %s486_s23 = scalar_lea.sflag (!%p4741_p2), [#allocation3], %s4277_s11 }
  0xdc   : > { %s4283_s17 = scalar_lea.vmem (!%p4741_p2), [#allocation2], %s2885_s25  ;;  %p4742_p6 = scmp.ne.s32.totalorder (!%p4741_p2), %s4724_s19, 0 }
  0xe1   : > { %3842 = dma.done.wait (%p4742_p6), %s486_s23, 256  }
  0xe2   : > { %3844 = vsyncadd (%p4742_p6), %s486_s23, 4294967040  ;;  %s494_s24 = sand.u32 1, %s3966_s13   ;;  %s3331_s26 = smul.u32 240, %s4277_s11 }
  0xe3   : > { %s495_s8 = scalar_lea.sflag [#allocation6], %s494_s24 }
  0xe4   : > { %s4291_s21 = scalar_lea.vmem [#allocation5], %s3331_s26 }
  0xe5   : > { %3846 = dma.done.wait (%p4742_p6), %s495_s8, 4032  }
  0xe6   : > { %3848 = vsyncadd (%p4742_p6), %s495_s8, 4294963264  ;;  %s4298_s27 = smul.u32 12, %s4277_s11  ;;  %s513_s3 = scalar_lea.sflag [#allocation9], %s494_s24 }
  0xe8   : > { %s507_s15 = scalar_lea.vmem [#allocation7], %s4298_s27  ;;  %s516_s28 = scalar_lea.vmem [#allocation8], %s4298_s27 }
  0xe9   : > { %3850 = dma.done.wait (%p4742_p6), %s513_s3, 384  }
  0xea   : > { %3852 = vsyncadd (%p4742_p6), %s513_s3, 4294966912  ;;  %s2886_s30 = sshll.u32 %s4277_s11, 9  ;;  %s525_s1 = scalar_lea.vmem [#allocation10], %s4298_s27 }
  0xeb   : > { %s531_s20 = scalar_lea.sflag [#allocation12], %s494_s24  ;;  %s4308_s16 = scalar_lea.vmem [#allocation11], %s2886_s30 }
  0xec   : > { %3854 = dma.done.wait (%p4742_p6), %s531_s20, 12288  }
  0xed   : > { %3856 = vsyncadd (%p4742_p6), %s531_s20, 4294955008  ;;  %v3892_v0 = vmov 0   ;;  %v3439_v1 = vld [vmem:[%s4291_s21 + $0x4] ss:$24 sps:$4 sm:$0xff]   ;;  %v3441_v2 = vld [vmem:[%s4291_s21] ss:$24 sps:$4 sm:$0xff]   ;;  %v654_v27 = vlaneseq }
  0xee   : > { %814 = vmatprep.mubr.bf16.mxu1 %v3892_v0  ;;  %896 = vmatprep.mubr.bf16.mxu0 %v3892_v0  ;;  %v3442_v3 = vld [vmem:[%s4291_s21 + $0x34] ss:$24 sps:$4 sm:$0xff]   ;;  %v649_v4 = vld [vmem:[%s4291_s21 + $0x60] sm:$0xff]  ;;  %v3444_v5 = vld [vmem:[%s4291_s21 + $0x30] ss:$24 sps:$4 sm:$0xff]   ;;  %vm763_vm0 = vcmask 1043456  }
  0xef   : > { %782 = vmatprep.subr.bf16.mxu1 %v3439_v1  ;;  %v2904_v6 = vcombine.high %v649_v4, %v649_v4  ;;  %v2903_v7 = vcombine.low %v649_v4, %v649_v4  ;;  %v3450_v8 = vld [vmem:[%s4291_s21 + $0x14] ss:$24 sps:$4 sm:$0xff]   ;;  %v3452_v9 = vld [vmem:[%s4291_s21 + $0x10] ss:$24 sps:$4 sm:$0xff]   ;;  %v635_v10 = vld [vmem:[%s4283_s17] sm:$0xff]  ;;  %vm759_vm1 = vcmask 326656  }
  0xf0   : > { %783 = vmatpush1.bf16.msra.mxu1 %v3441_v2  ;;  %v3449_v11 = vld [vmem:[%s4291_s21 + $0xc] ss:$24 sps:$4 sm:$0xff]   ;;  %864 = vmatprep.subr.bf16.mxu0 %v3450_v8  ;;  %v3458_v14 = vld [vmem:[%s4291_s21 + $0x40] ss:$24 sps:$4 sm:$0xff]   ;;  %v651_v18 = vld [vmem:[%s4291_s21 + $0x70] sm:$0xff]  ;;  %v636_v19 = vpack.c.bf16 %v635_v10, %v635_v10  ;;  %v655_v28 = vshrl.u32 %v654_v27, 7 }
  0xf1   : > { %784 = vmatprep.subr.bf16.mxu1 %v3442_v3  ;;  %v765_v12 = vsel %vm763_vm0, %v2903_v7, 0  ;;  %865 = vmatpush1.bf16.msra.mxu0 %v3452_v9  ;;  %v3456_v13 = vld [vmem:[%s4291_s21 + $0x44] ss:$24 sps:$4 sm:$0xff]   ;;  %v650_v15 = vld [vmem:[%s4291_s21 + $0x68] sm:$0xff]  ;;  %v2908_v21 = vcombine.high %v651_v18, %v651_v18  ;;  %v2907_v22 = vcombine.low %v651_v18, %v651_v18  ;;  %v3453_v25 = vld [vmem:[%s4291_s21 + $0x38] ss:$24 sps:$4 sm:$0xff]  }
  0xf2   : > { %v3447_v16 = vld [vmem:[%s4291_s21 + $0x8] ss:$24 sps:$4 sm:$0xff]   ;;  %v2905_v17 = vcombine.low %v650_v15, %v650_v15  ;;  %v3455_v20 = vld [vmem:[%s4291_s21 + $0x3c] ss:$24 sps:$4 sm:$0xff]   ;;  %866 = vmatprep.subr.bf16.mxu0 %v3456_v13  ;;  %v2906_v26 = vcombine.high %v650_v15, %v650_v15  ;;  %v4342_v29 = vsub.s32 0, %v655_v28  ;;  %v4344_v30 = vsub.s32 1, %v655_v28 }
  0xf3   : > { %v777_v24 = vsel %vm763_vm0, %v2907_v22, 0  ;;  %v652_v31 = vld [vmem:[%s507_s15] sm:$0x3f]  ;;  %v4350_v38 = vsub.s32 5, %v655_v28  ;;  %v4352_v41 = vsub.s32 2, %v655_v28  ;;  %v4354_v42 = vsub.s32 4, %v655_v28 }
  0xf4   : > { %785 = vmatpush1.bf16.msra.mxu1 %v3444_v5  ;;  %v771_v23 = vsel %vm763_vm0, %v2905_v17, 0  ;;  %v657_v33 = vrot.slane %v652_v31, %v4342_v29  ;;  %v661_v34 = vrot.slane %v652_v31, %v4344_v30  ;;  %v4356_v44 = vsub.s32 3, %v655_v28  ;;  %s3893_s19 = smov 64   ;;  %s2887_s22 = sshll.u32 %s4277_s11, 8 }
  0xf5   : > { %2909 = vmatprep.subr.msk.bf16.mxu1 %vm763_vm0, %v2904_v6  ;;  %867 = vmatpush1.bf16.msra.mxu0 %v3458_v14  ;;  %v677_v47 = vrot.slane %v652_v31, %v4350_v38  ;;  %v665_v51 = vrot.slane %v652_v31, %v4352_v41  ;;  %v673_v52 = vrot.slane %v652_v31, %v4354_v42  ;;  %vm927_vm8 = vcmask 523264   ;;  %s4447_s14 = scalar_lea.vmem [#allocation13], %s2887_s22  ;;  %s2889_s29 = sshll.u32 %s3966_s13, 1 }
  0xf6   : > { %2913 = vmatprep.subr.msk.bf16.mxu0 %vm763_vm0, %v2908_v21  ;;  %v669_v53 = vrot.slane %v652_v31, %v4356_v44  ;;  %p623_p13 = scmp.lt.s32.totalorder %s2889_s29, 3  ;;  %s4743_s26 = sld [smem:[#allocation28_spill]] }
  0xf7   : > { %s3166_s27 = sshll.u32 %s3966_s13, 8  ;;  %s4745_s30 = sld [smem:[#allocation29_spill]] }
  0xf8   : > { %787 = vmatpush1.bf16.msra.mxu1 %v765_v12  ;;  %s4758_s29 = smov (!%p623_p13, %s2889_s29), 3  ;;  %s3894_s13 = smov [#allocation14]  }
  0xf9   : > { %823 = vmatprep.subr.bf16.mxu1 %v3449_v11  ;;  %869 = vmatpush1.bf16.msra.mxu0 %v777_v24  ;;  %s4501_s23 = scalar_lea.vmem %s4696_s6, %s4758_s29  ;;  %s3801_s22 = sshll.u32 %s3894_s13, 4  ;;  %s3802_s22 = int_to_ptr.vmem [resolvable:$false] %s3801_s22 }
  0xfb   : > { %2910 = vmatmul.mubr.msk.bf16.vlgmr.msra.gmra.mrb[0].mxu1 %vm759_vm1, %v636_v19 }
  0xfc   : > { %824 = vmatpush1.bf16.msra.mxu1 %v3447_v16  ;;  %855 = vmatprep.mubr.bf16.mxu1 %v3892_v0  ;;  %s4522_s8 = scalar_lea.vmem %s4743_s26, %s4758_s29 }
  0xfd   : > { %825 = vmatprep.subr.bf16.mxu1 %v3455_v20  ;;  %2914 = vmatmul.mubr.msk.bf16.vlgmr.msra.gmra.mrb[0].mxu0 %vm759_vm1, %v636_v19  ;;  %s4645_s20 = scalar_lea.hbm %s4745_s30, %s3166_s27 }
 0x100   : > { %826 = vmatpush1.bf16.msra.mxu1 %v3453_v25 }
 0x101   : > { %2911 = vmatprep.subr.msk.bf16.mxu1 %vm763_vm0, %v2906_v26 }
 0x104   : > { %828 = vmatpush1.bf16.msra.mxu1 %v771_v23 }
 0x107   : > { %2912 = vmatmul.mubr.msk.bf16.vlgmr.msra.gmra.mrb[4].mxu1 %vm759_vm1, %v636_v19 }
 0x1ce   : > { %v816_v32 = vpop.f32.mrb[0].mxu1 }
 0x1cf   : > { %v818_v35 = vpop.f32.mrb[1].mxu1  ;;  %v817_v39 = vadd.f32 %v816_v32, %v657_v33 }
 0x1d0   : > { %v820_v36 = vpop.f32.mrb[2].mxu1  ;;  %v819_v40 = vadd.f32 %v818_v35, %v661_v34  ;;  %v898_v43 = vpop.f32.mrb[0].mxu0 }
 0x1d1   : > { %v821_v37 = vpop.f32.mrb[3].mxu1  ;;  %v900_v45 = vpop.f32.mrb[1].mxu0  ;;  %v911_v49 = vmul.f32 0.01, %v817_v39  ;;  %vm905_vm2 = vcmp.gt.f32.partialorder %v817_v39, 0.0  ;;  %v899_v60 = vadd.f32 %v898_v43, %v673_v52  ;;  %v3466_v43 = vld [vmem:[%s4308_s16 + $0x80] sm:$0xff]  }
 0x1d2   : > { %v902_v46 = vpop.f32.mrb[2].mxu0  ;;  %v912_v50 = vmul.f32 0.01, %v819_v40  ;;  %vm906_vm3 = vcmp.gt.f32.partialorder %v819_v40, 0.0  ;;  %v901_v55 = vadd.f32 %v900_v45, %v677_v47  ;;  %v3463_v37 = vld [vmem:[%s4308_s16 + $0x40] sm:$0xff]   ;;  %v3467_v45 = vld [vmem:[%s4308_s16 + $0x48] sm:$0xff]  }
 0x1d3   : > { %v903_v48 = vpop.f32.mrb[3].mxu0  ;;  %v917_v56 = vsel %vm905_vm2, %v817_v39, %v911_v49  ;;  %v915_v6 = vmul.f32 0.01, %v899_v60  ;;  %vm909_vm7 = vcmp.gt.f32.partialorder %v899_v60, 0.0  ;;  %v3464_v39 = vld [vmem:[%s4308_s16] sm:$0xff]   ;;  %3167 = vmatprep.subr.bf16.mxu1 %v3463_v37  ;;  %v3469_v46 = vld [vmem:[%s4308_s16 + $0xc8] sm:$0xff]  }
 0x1d4   : > { %v918_v57 = vsel %vm906_vm3, %v819_v40, %v912_v50  ;;  %v916_v4 = vmul.f32 0.01, %v901_v55  ;;  %vm910_vm6 = vcmp.gt.f32.partialorder %v901_v55, 0.0  ;;  %v3465_v40 = vld [vmem:[%s4308_s16 + $0xc0] sm:$0xff]   ;;  %3168 = vmatpush3.bf16.msra.mxu1 %v3464_v39  ;;  %v3468_v47 = vld [vmem:[%s4308_s16 + $0x8] sm:$0xff]   ;;  %v3471_v49 = vld [vmem:[%s4308_s16 + $0x50] sm:$0xff]  }
 0x1d5   : > { %v923_v2 = vadd.f32 %v918_v57, %v917_v56  ;;  %v921_v11 = vsel %vm909_vm7, %v899_v60, %v915_v6  ;;  %3195 = vmatprep.subr.bf16.mxu0 %v3465_v40  ;;  %v3470_v48 = vld [vmem:[%s4308_s16 + $0x88] sm:$0xff]   ;;  %3169 = vmatprep.subr.bf16.mxu1 %v3467_v45  ;;  %v3473_v50 = vld [vmem:[%s4308_s16 + $0xd0] sm:$0xff]   ;;  %v3482_v60 = vld [vmem:[%s4308_s16 + $0xa0] sm:$0xff]  }
 0x1d6   : > { %v922_v9 = vsel %vm910_vm6, %v901_v55, %v916_v4  ;;  %3196 = vmatpush3.bf16.msra.mxu0 %v3466_v43  ;;  %v3474_v52 = vld [vmem:[%s4308_s16 + $0x90] sm:$0xff]   ;;  %v3476_v55 = vld [vmem:[%s4308_s16 + $0x18] sm:$0xff]   ;;  %v3486_v4 = vld [vmem:[%s4308_s16 + $0xa8] sm:$0xff]  }
 0x1d7   : > { %v928_v13 = vsel %vm927_vm8, %v922_v9, 0.0  ;;  %3197 = vmatprep.subr.bf16.mxu0 %v3469_v46  ;;  %v3487_v6 = vld [vmem:[%s4308_s16 + $0x70] sm:$0xff]   ;;  %v3494_v39 = vld [vmem:[%s4308_s16 + $0xb8] sm:$0xff]  }
 0x1d8   : > { %3170 = vmatpush3.bf16.msra.mxu1 %v3468_v47 }
 0x1d9   : > { %3171 = vmatprep.subr.bf16.mxu1 %v3471_v49 }
 0x1da   : > { %v857_v54 = vpop.f32.mrb[4].mxu1  ;;  %3198 = vmatpush3.bf16.msra.mxu0 %v3470_v48 }
 0x1db   : > { %v858_v58 = vadd.f32 %v857_v54, %v665_v51  ;;  %v859_v59 = vpop.f32.mrb[5].mxu1  ;;  %v3472_v51 = vld [vmem:[%s4308_s16 + $0x10] sm:$0xff]   ;;  %3199 = vmatprep.subr.bf16.mxu0 %v3473_v50  ;;  %v3477_v54 = vld [vmem:[%s4308_s16 + $0xd8] sm:$0xff]  }
 0x1dc   : > { %v860_v61 = vadd.f32 %v859_v59, %v669_v53  ;;  %v861_v62 = vpop.f32.mrb[6].mxu1  ;;  %v3475_v53 = vld [vmem:[%s4308_s16 + $0x58] sm:$0xff]   ;;  %3172 = vmatpush3.bf16.msra.mxu1 %v3472_v51  ;;  %v3480_v59 = vld [vmem:[%s4308_s16 + $0x20] sm:$0xff]  }
 0x1dd   : > { %vm907_vm4 = vcmp.gt.f32.partialorder %v858_v58, 0.0  ;;  %v913_v63 = vmul.f32 0.01, %v858_v58  ;;  %v862_v1 = vpop.f32.mrb[7].mxu1  ;;  %3173 = vmatprep.subr.bf16.mxu1 %v3475_v53 }
 0x1de   : > { %vm908_vm5 = vcmp.gt.f32.partialorder %v860_v61, 0.0  ;;  %v914_v3 = vmul.f32 0.01, %v860_v61  ;;  %3200 = vmatpush3.bf16.msra.mxu0 %v3474_v52 }
 0x1df   : > { %v919_v5 = vsel %vm907_vm4, %v858_v58, %v913_v63  ;;  %3201 = vmatprep.subr.bf16.mxu0 %v3477_v54  ;;  %v3481_v58 = vld [vmem:[%s4308_s16 + $0xe0] sm:$0xff]  }
 0x1e0   : > { %v920_v7 = vsel %vm908_vm5, %v860_v61, %v914_v3  ;;  %v924_v8 = vadd.f32 %v923_v2, %v919_v5  ;;  %3174 = vmatpush3.bf16.msra.mxu1 %v3476_v55  ;;  %v3483_v61 = vld [vmem:[%s4308_s16 + $0x68] sm:$0xff]  }
 0x1e1   : > { %v3484_v2 = vld [vmem:[%s4308_s16 + $0x28] sm:$0xff]  }
 0x1e2   : > { %v925_v10 = vadd.f32 %v924_v8, %v920_v7  ;;  %v3485_v3 = vld [vmem:[%s4308_s16 + $0xe8] sm:$0xff]   ;;  %v3489_v8 = vld [vmem:[%s4308_s16 + $0xf0] sm:$0xff]  }
 0x1e3   : > { %v3501_v54 = vld [vmem:[%s4291_s21 + $0x7c] ss:$24 sps:$4 sm:$0xff]  }
 0x1e4   : > { %v926_v12 = vadd.f32 %v925_v10, %v921_v11  ;;  %v3490_v10 = vld [vmem:[%s4308_s16 + $0xb0] sm:$0xff]  }
 0x1e6   : > { %v929_v14 = vadd.f32 %v928_v13, %v926_v12 }
 0x1e8   : > { %930 = vadd.xlane.f32.xlu0 %v929_v14 }
 0x275   : > { %v931_v15 = vpop.xlane.xlu0 %930 }
 0x276   : > { %v933_v16 = vmul.f32 0.0014204546, %v931_v15 }
 0x278   : > { %v4363_v17 = vsub.f32 %v917_v56, %v933_v16  ;;  %v4365_v18 = vsub.f32 %v918_v57, %v933_v16  ;;  %v4367_v19 = vsub.f32 %v919_v5, %v933_v16  ;;  %v4369_v20 = vsub.f32 %v920_v7, %v933_v16  ;;  %v3478_v56 = vld [vmem:[%s4308_s16 + $0x98] sm:$0xff]   ;;  %v3479_v57 = vld [vmem:[%s4308_s16 + $0x60] sm:$0xff]   ;;  %v3488_v7 = vld [vmem:[%s4308_s16 + $0x30] sm:$0xff]  }
 0x279   : > { %v4375_v23 = vsub.f32 %v922_v9, %v933_v16  ;;  %v4377_v24 = vsub.f32 %v921_v11, %v933_v16  ;;  %3202 = vmatpush3.bf16.msra.mxu0 %v3478_v56  ;;  %3175 = vmatprep.subr.bf16.mxu1 %v3479_v57  ;;  %v963_v5 = vld [vmem:[%s516_s28] sm:$0x3f]  ;;  %v1001_v9 = vld [vmem:[%s525_s1] sm:$0x3f] }
 0x27a   : > { %v940_v21 = vmul.f32 %v4363_v17, %v4363_v17  ;;  %v941_v22 = vmul.f32 %v4365_v18, %v4365_v18  ;;  %v942_v25 = vmul.f32 %v4367_v19, %v4367_v19  ;;  %v943_v27 = vmul.f32 %v4369_v20, %v4369_v20  ;;  %3203 = vmatprep.subr.bf16.mxu0 %v3481_v58  ;;  %v3495_v56 = vld [vmem:[%s4447_s14 + $0x40] sm:$0xff]  }
 0x27b   : > { %v945_v31 = vmul.f32 %v4375_v23, %v4375_v23  ;;  %v944_v32 = vmul.f32 %v4377_v24, %v4377_v24  ;;  %3176 = vmatpush3.bf16.msra.mxu1 %v3480_v59  ;;  %v984_v11 = vrot.slane %v963_v5, %v4354_v42  ;;  %v972_v12 = vrot.slane %v963_v5, %v4344_v30 }
 0x27c   : > { %v946_v26 = vadd.f32 %v941_v22, %v940_v21  ;;  %3177 = vmatprep.subr.bf16.mxu1 %v3483_v61  ;;  %v976_v13 = vrot.slane %v963_v5, %v4352_v41  ;;  %v968_v14 = vrot.slane %v963_v5, %v4342_v29  ;;  %v1022_v16 = vrot.slane %v1001_v9, %v4354_v42 }
 0x27d   : > { %v950_v35 = vsel %vm927_vm8, %v945_v31, 0.0  ;;  %3204 = vmatpush3.bf16.msra.mxu0 %v3482_v60  ;;  %v1010_v21 = vrot.slane %v1001_v9, %v4344_v30  ;;  %v1014_v22 = vrot.slane %v1001_v9, %v4352_v41  ;;  %v1018_v37 = vrot.slane %v1001_v9, %v4356_v44 }
 0x27e   : > { %v947_v28 = vadd.f32 %v946_v26, %v942_v25  ;;  %3205 = vmatprep.subr.bf16.mxu0 %v3485_v3  ;;  %v980_v25 = vrot.slane %v963_v5, %v4356_v44  ;;  %v3491_v26 = vld [vmem:[%s4308_s16 + $0x78] sm:$0xff]   ;;  %v1026_v53 = vrot.slane %v1001_v9, %v4350_v38 }
 0x27f   : > { %3178 = vmatpush3.bf16.msra.mxu1 %v3484_v2 }
 0x280   : > { %v948_v33 = vadd.f32 %v947_v28, %v943_v27  ;;  %3179 = vmatprep.subr.bf16.mxu1 %v3487_v6 }
 0x281   : > { %3206 = vmatpush3.bf16.msra.mxu0 %v3486_v4 }
 0x282   : > { %v949_v34 = vadd.f32 %v948_v33, %v944_v32  ;;  %3207 = vmatprep.subr.bf16.mxu0 %v3489_v8  ;;  %v3492_v33 = vld [vmem:[%s4308_s16 + $0x38] sm:$0xff]  }
 0x283   : > { %3180 = vmatpush3.bf16.msra.mxu1 %v3488_v7 }
 0x284   : > { %v951_v36 = vadd.f32 %v950_v35, %v949_v34  ;;  %v3493_v34 = vld [vmem:[%s4308_s16 + $0xf8] sm:$0xff]   ;;  %3181 = vmatprep.subr.bf16.mxu1 %v3491_v26  ;;  %v2978_v26 = vld [vmem:[%s4291_s21 + $0xd8] sm:$0xff] }
 0x285   : > { %3208 = vmatpush3.bf16.msra.mxu0 %v3490_v10 }
 0x286   : > { %952 = vadd.xlane.f32.xlu0 %v951_v36  ;;  %v1006_v36 = vrot.slane %v1001_v9, %v4342_v29  ;;  %3209 = vmatprep.subr.bf16.mxu0 %v3493_v34  ;;  %v3496_v9 = vld [vmem:[%s4447_s14] sm:$0xff]  }
 0x287   : > { %3182 = vmatpush3.bf16.msra.mxu1 %v3492_v33  ;;  %v3511_v33 = vld [vmem:[%s4447_s14 + $0x60] sm:$0xff]  }
 0x288   : > { %3223 = vmatprep.subr.bf16.mxu1 %v3495_v56  ;;  %v3512_v34 = vld [vmem:[%s4447_s14 + $0x20] sm:$0xff]  }
 0x289   : > { %3210 = vmatpush3.bf16.msra.mxu0 %v3494_v39 }
 0x28a   : > { %1776 = vmatprep.subr.bf16.mxu0 %v3501_v54 }
 0x313   : > { %v953_v62 = vpop.xlane.xlu0 %952 }
 0x314   : > { %v954_v63 = vmul.f32 0.0014204546, %v953_v62 }
 0x316   : > { %v955_v1 = vadd.f32 1e-05, %v954_v63 }
 0x318   : > { %3583 = vrsqrt.f32 %v955_v1 }
 0x322   : > { %v3584_v15 = vpop.eup %3583 }
 0x323   : > { %v961_v27 = vmul.f32 %v3584_v15, %v4377_v24  ;;  %v958_v28 = vmul.f32 %v3584_v15, %v4365_v18  ;;  %v959_v31 = vmul.f32 %v3584_v15, %v4367_v19  ;;  %v957_v32 = vmul.f32 %v3584_v15, %v4363_v17 }
 0x324   : > { %v960_v35 = vmul.f32 %v3584_v15, %v4369_v20  ;;  %v988_v20 = vrot.slane %v963_v5, %v4350_v38  ;;  %v962_v50 = vmul.f32 %v3584_v15, %v4375_v23  ;;  %v3502_v15 = vld [vmem:[%s4447_s14 + $0x50] sm:$0xff]  }
 0x325   : > { %v999_v40 = vmul.f32 %v984_v11, %v961_v27  ;;  %v996_v43 = vmul.f32 %v972_v12, %v958_v28  ;;  %v997_v45 = vmul.f32 %v976_v13, %v959_v31  ;;  %v995_v24 = vmul.f32 %v968_v14, %v957_v32  ;;  %v3497_v11 = vld [vmem:[%s4447_s14 + $0x48] sm:$0xff]   ;;  %v3508_v27 = vld [vmem:[%s4447_s14 + $0x18] sm:$0xff]  }
 0x326   : > { %v998_v18 = vmul.f32 %v980_v25, %v960_v35  ;;  %v1000_v52 = vmul.f32 %v988_v20, %v962_v50  ;;  %v3499_v12 = vld [vmem:[%s4291_s21 + $0x78] ss:$24 sps:$4 sm:$0xff]   ;;  %v2995_v28 = vcombine.high %v2978_v26, %v2978_v26  ;;  %v2994_v31 = vcombine.low %v2978_v26, %v2978_v26  ;;  %v3515_v35 = vld [vmem:[%s4291_s21 + $0x84] ss:$24 sps:$4 sm:$0xff]  }
 0x327   : > { %v1037_v19 = vadd.f32 %v1022_v16, %v999_v40  ;;  %v1034_v17 = vadd.f32 %v1010_v21, %v996_v43  ;;  %v1035_v46 = vadd.f32 %v1014_v22, %v997_v45  ;;  %v1033_v48 = vadd.f32 %v1006_v36, %v995_v24  ;;  %v3498_v14 = vld [vmem:[%s4447_s14 + $0x8] sm:$0xff]   ;;  %v3503_v16 = vld [vmem:[%s4447_s14 + $0x10] sm:$0xff]   ;;  %v3507_v25 = vld [vmem:[%s4447_s14 + $0x58] sm:$0xff]  }
 0x328   : > { %v1036_v49 = vadd.f32 %v1018_v37, %v998_v18  ;;  %v1038_v55 = vadd.f32 %v1026_v53, %v1000_v52  ;;  %v3506_v21 = vld [vmem:[%s4291_s21 + $0xac] ss:$24 sps:$4 sm:$0xff]   ;;  %v3504_v22 = vld [vmem:[%s4291_s21 + $0xa8] ss:$24 sps:$4 sm:$0xff]   ;;  %v1759_v32 = vsel %vm763_vm0, %v2994_v31, 0 }
 0x329   : > { %1052 = vrot.lane.b32.xlu0 %v1037_v19, %s3893_s19  ;;  %v3419_v47 = vpack.i.bf16 %v1035_v46, %v1034_v17  ;;  %v2965_v36 = vld [vmem:[%s4283_s17 + $0x8] sm:$0xff]  ;;  %v3513_v37 = vld [vmem:[%s4291_s21 + $0x80] ss:$24 sps:$4 sm:$0xff]  }
 0x32a   : > { %v3424_v51 = vpack.i.bf16 %v1036_v49, %v1033_v48  ;;  %v4475_v39 = vpack.c.bf16 %v2965_v36, %v2965_v36  ;;  %v3516_v40 = vld [vmem:[%s4447_s14 + $0x68] sm:$0xff]   ;;  %v3521_v18 = vld [vmem:[%s4447_s14 + $0x70] sm:$0xff]   ;;  %v2915_v52 = vld [vmem:[%s4501_s23] ss:$0 sm:$0xff] }
 0x32b   : > { %3420 = vrot.lane.b32.xlu1 %v3419_v47, %s3893_s19  ;;  %v3517_v43 = vld [vmem:[%s4447_s14 + $0x28] sm:$0xff]   ;;  %v3525_v47 = vld [vmem:[%s4447_s14 + $0x78] sm:$0xff]  }
 0x32c   : > { %v3520_v45 = vld [vmem:[%s4291_s21 + $0xb4] ss:$24 sps:$4 sm:$0xff]   ;;  %v3518_v24 = vld [vmem:[%s4291_s21 + $0xb0] ss:$24 sps:$4 sm:$0xff]  }
 0x32d   : > { %v3529_v50 = vld [vmem:[%s4291_s21 + $0x8c] ss:$24 sps:$4 sm:$0xff]  }
 0x32f   : > { %3425 = vrot.lane.b32.xlu1 %v3424_v51, %s3893_s19 }
 0x333   : > { %1063 = vrot.lane.b32.xlu1 %v1038_v55, %s3893_s19 }
 0x39b   : > { %v1053_v1 = vpop.permute.xlu0 %1052 }
 0x39d   : > { %v3421_v23 = vpop.permute.xlu1 %3420 }
 0x39e   : > { %v3423_v57 = vunpack.i.h.bf16 %v3421_v23  ;;  %v3422_v58 = vunpack.i.l.bf16 %v3421_v23 }
 0x3a0   : > { %v1055_v59 = vsel %vm927_vm8, %v3422_v58, %v3423_v57 }
 0x3a1   : > { %v3426_v60 = vpop.permute.xlu1 %3425  ;;  %v1068_v61 = vpack.c.bf16 %v1055_v59, %v1034_v17  ;;  %v3522_v17 = vld [vmem:[%s4447_s14 + $0x30] sm:$0xff]  }
 0x3a2   : > { %v3428_v62 = vunpack.i.h.bf16 %v3426_v60  ;;  %v3427_v63 = vunpack.i.l.bf16 %v3426_v60 }
 0x3a3   : > { %1367 = vmatprep.mubr.bf16.mxu1 %v1068_v61 }
 0x3a4   : > { %v1054_v2 = vsel %vm927_vm8, %v3427_v63, %v3422_v58  ;;  %v1057_v3 = vsel %vm927_vm8, %v3428_v62, %v1053_v1  ;;  %v1056_v4 = vsel %vm927_vm8, %v3423_v57, %v3428_v62 }
 0x3a5   : > { %v1067_v5 = vpack.c.bf16 %v1054_v2, %v1033_v48  ;;  %v1064_v6 = vpop.permute.xlu1 %1063  ;;  %v1070_v7 = vpack.c.bf16 %v1057_v3, %v1036_v49  ;;  %v1069_v8 = vpack.c.bf16 %v1056_v4, %v1035_v46  ;;  %v3526_v49 = vld [vmem:[%s4447_s14 + $0x38] sm:$0xff]  }
 0x3a6   : > { %v1065_v10 = vsel %vm927_vm8, %v1053_v1, %v1064_v6 }
 0x3a7   : > { %v1071_v13 = vpack.c.bf16 %v1065_v10, %v1037_v19  ;;  %1368 = vmatmul.mubr.bf16.vlgmr.msra.gmra.mrb[8].mxu1 %v1067_v5  ;;  %1416 = vmatprep.mubr.bf16.mxu0 %v1070_v7  ;;  %v2979_v19 = vld [vmem:[%s4291_s21 + $0xe0] sm:$0xff] }
 0x3a8   : > { %1375 = vmatprep.mubr.bf16.mxu1 %v1069_v8  ;;  %1417 = vmatmul.mubr.bf16.vlgmr.msra.gmra.mrb[4].mxu0 %v1069_v8  ;;  %v2997_v46 = vcombine.high %v2979_v19, %v2979_v19  ;;  %v2996_v20 = vcombine.low %v2979_v19, %v2979_v19  ;;  %v3530_v19 = vld [vmem:[%s4291_s21 + $0xb8] ss:$24 sps:$4 sm:$0xff]  }
 0x3a9   : > { %1424 = vmatprep.mubr.bf16.mxu0 %v1071_v13  ;;  %3224 = vmatpush3.bf16.msra.mxu1 %v3496_v9 }
 0x3aa   : > { %3225 = vmatprep.subr.bf16.mxu1 %v3497_v11  ;;  %1777 = vmatpush1.bf16.msra.mxu0 %v3499_v12  ;;  %v1765_v48 = vsel %vm763_vm0, %v2996_v20, 0 }
 0x3ab   : > { %1778 = vmatprep.subr.bf16.mxu0 %v3506_v21 }
 0x3ad   : > { %3226 = vmatpush3.bf16.msra.mxu1 %v3498_v14 }
 0x3ae   : > { %3227 = vmatprep.subr.bf16.mxu1 %v3502_v15  ;;  %1779 = vmatpush1.bf16.msra.mxu0 %v3504_v22 }
 0x3af   : > { %1376 = vmatmul.mubr.bf16.gmra.mrb[12].mxu1 %v1068_v61  ;;  %3000 = vmatprep.subr.msk.bf16.mxu0 %vm763_vm0, %v2995_v28 }
 0x3b0   : > { %1425 = vmatmul.mubr.bf16.gmra.mrb[8].mxu0 %v1070_v7 }
 0x3b1   : > { %1808 = vmatprep.mubr.bf16.mxu0 %v3892_v0  ;;  %3228 = vmatpush3.bf16.msra.mxu1 %v3503_v16 }
 0x3b2   : > { %3229 = vmatprep.subr.bf16.mxu1 %v3507_v25  ;;  %1781 = vmatpush1.bf16.msra.mxu0 %v1759_v32 }
 0x3b3   : > { %1817 = vmatprep.subr.bf16.mxu0 %v3515_v35 }
 0x3b5   : > { %3230 = vmatpush3.bf16.msra.mxu1 %v3508_v27 }
 0x3b6   : > { %3231 = vmatprep.subr.bf16.mxu1 %v3511_v33 }
 0x3b8   : > { %3001 = vmatmul.mubr.msk.bf16.vlgmr.msra.gmra.mrb[12].mxu0 %vm759_vm1, %v4475_v39 }
 0x3b9   : > { %3232 = vmatpush3.bf16.msra.mxu1 %v3512_v34  ;;  %1818 = vmatpush1.bf16.msra.mxu0 %v3513_v37 }
 0x3ba   : > { %1849 = vmatprep.mubr.bf16.mxu0 %v3892_v0  ;;  %3233 = vmatprep.subr.bf16.mxu1 %v3516_v40 }
 0x3bb   : > { %1819 = vmatprep.subr.bf16.mxu0 %v3520_v45 }
 0x3bd   : > { %3234 = vmatpush3.bf16.msra.mxu1 %v3517_v43  ;;  %1820 = vmatpush1.bf16.msra.mxu0 %v3518_v24  ;;  %v3527_v43 = vld [vmem:[%s4291_s21 + $0x88] ss:$24 sps:$4 sm:$0xff]   ;;  %v3532_v24 = vld [vmem:[%s4291_s21 + $0xbc] ss:$24 sps:$4 sm:$0xff]  }
 0x3be   : > { %3235 = vmatprep.subr.bf16.mxu1 %v3521_v18  ;;  %3002 = vmatprep.subr.msk.bf16.mxu0 %vm763_vm0, %v2997_v46  ;;  %v2980_v18 = vld [vmem:[%s4291_s21 + $0xe8] sm:$0xff]  ;;  %s4529_s21 = scalar_lea.vmem [#allocation14], %s2885_s25  ;;  %s4744_s25 = sld [smem:[#allocation24_spill]] }
 0x3bf   : > { %v2998_v46 = vcombine.low %v2980_v18, %v2980_v18 }
 0x3c1   : > { %3236 = vmatpush3.bf16.msra.mxu1 %v3522_v17  ;;  %1822 = vmatpush1.bf16.msra.mxu0 %v1765_v48  ;;  %v2999_v17 = vcombine.high %v2980_v18, %v2980_v18  ;;  %v1771_v20 = vsel %vm763_vm0, %v2998_v46, 0 }
 0x3c2   : > { %3237 = vmatprep.subr.bf16.mxu1 %v3525_v47 }
 0x3c4   : > { %3003 = vmatmul.mubr.msk.bf16.vlgmr.msra.gmra.mrb[16].mxu0 %vm759_vm1, %v4475_v39  ;;  %p4747_p10 = scmp.ne.s32.totalorder %s4744_s25, 0 }
 0x3c5   : > { %3238 = vmatpush3.bf16.msra.mxu1 %v3526_v49 }
 0x3c6   : > { %1858 = vmatprep.subr.bf16.mxu1 %v3529_v50 }
 0x47a   : > { %v3183_v51 = vpop.f32.mrb[8].mxu1 }
 0x47b   : > { %v3184_v53 = vpop.f32.mrb[9].mxu1  ;;  %v3211_v54 = vpop.f32.mrb[4].mxu0 }
 0x47c   : > { %v3185_v55 = vadd.f32 %v3184_v53, %v3183_v51  ;;  %v3186_v56 = vpop.f32.mrb[10].mxu1  ;;  %v3212_v23 = vpop.f32.mrb[5].mxu0 }
 0x47d   : > { %v3213_v57 = vadd.f32 %v3212_v23, %v3211_v54  ;;  %v3187_v58 = vpop.f32.mrb[11].mxu1  ;;  %v3214_v59 = vpop.f32.mrb[6].mxu0  ;;  %v2981_v54 = vld [vmem:[%s507_s15 + $0x6] sm:$0x3f]  ;;  %s2641_s15 = sshll.u32 %s4529_s21, 4  ;;  %s4647_s15 = int_to_ptr.vmem [resolvable:$true] %s2641_s15 }
 0x47e   : > { %v1370_v60 = vadd.f32 %v3185_v55, %v2915_v52  ;;  %v3188_v61 = vadd.f32 %v3187_v58, %v3186_v56  ;;  %v3215_v62 = vpop.f32.mrb[7].mxu0  ;;  %v1653_v55 = vrot.slane %v2981_v54, %v4342_v29  ;;  %v1657_v56 = vrot.slane %v2981_v54, %v4344_v30  ;;  %p3804_p4 = scmp.lt.s32.totalorder %s4647_s15, %s3802_s22 }
 0x47f   : > { %v3216_v63 = vadd.f32 %v3215_v62, %v3214_v59  ;;  %v1661_v58 = vrot.slane %v2981_v54, %v4352_v41  ;;  %v1665_v62 = vrot.slane %v2981_v54, %v4356_v44 }
 0x480   : > { %v1419_v1 = vadd.f32 %v3213_v57, %v1370_v60  ;;  %v1373_v2 = vadd.f32 %v3188_v61, %v2915_v52 }
 0x482   : > { %v1437_v3 = vmul.f32 0.01, %v1419_v1  ;;  %v1422_v4 = vadd.f32 %v3216_v63, %v1373_v2  ;;  %v3189_v5 = vpop.f32.mrb[12].mxu1  ;;  %vm1433_vm9 = vcmp.gt.f32.partialorder %v1419_v1, 0.0  ;;  %v2948_v63 = vld [vmem:[%s4522_s8] ss:$0 sm:$0xff] }
 0x483   : > { %v3190_v6 = vpop.f32.mrb[13].mxu1  ;;  %v3217_v7 = vpop.f32.mrb[8].mxu0 }
 0x484   : > { %vm1434_vm10 = vcmp.gt.f32.partialorder %v1422_v4, 0.0  ;;  %v1438_v8 = vmul.f32 0.01, %v1422_v4  ;;  %v3191_v9 = vadd.f32 %v3190_v6, %v3189_v5  ;;  %v3192_v10 = vpop.f32.mrb[14].mxu1  ;;  %v3218_v11 = vpop.f32.mrb[9].mxu0  ;;  %v1441_v15 = vsel %vm1433_vm9, %v1419_v1, %v1437_v3 }
 0x485   : > { %v3219_v12 = vadd.f32 %v3218_v11, %v3217_v7  ;;  %v3193_v13 = vpop.f32.mrb[15].mxu1  ;;  %v3220_v14 = vpop.f32.mrb[10].mxu0 }
 0x486   : > { %v1442_v16 = vsel %vm1434_vm10, %v1422_v4, %v1438_v8  ;;  %v1378_v21 = vadd.f32 %v3191_v9, %v2915_v52  ;;  %v3194_v22 = vadd.f32 %v3193_v13, %v3192_v10  ;;  %v3221_v25 = vpop.f32.mrb[11].mxu0 }
 0x487   : > { %v1445_v26 = vmax.f32 %v1441_v15, %v1442_v16  ;;  %v3222_v27 = vadd.f32 %v3221_v25, %v3220_v14  ;;  %v1669_v15 = vrot.slane %v2981_v54, %v4354_v42  ;;  %v1673_v16 = vrot.slane %v2981_v54, %v4350_v38 }
 0x488   : > { %v1427_v28 = vadd.f32 %v3219_v12, %v1378_v21  ;;  %v1381_v31 = vadd.f32 %v3194_v22, %v2915_v52 }
 0x489   : > { %v1447_v45 = vpack.c.bf16 %v1445_v26, %v1445_v26 }
 0x48a   : > { %v1439_v32 = vmul.f32 0.01, %v1427_v28  ;;  %v1430_v33 = vadd.f32 %v3222_v27, %v1381_v31  ;;  %vm1435_vm11 = vcmp.gt.f32.partialorder %v1427_v28, 0.0 }
 0x48b   : > { %v1810_v47 = vpop.f32.mrb[12].mxu0 }
 0x48c   : > { %vm1436_vm12 = vcmp.gt.f32.partialorder %v1430_v33, 0.0  ;;  %v1440_v34 = vmul.f32 0.01, %v1430_v33  ;;  %v1443_v35 = vsel %vm1435_vm11, %v1427_v28, %v1439_v32  ;;  %v1812_v48 = vpop.f32.mrb[13].mxu0  ;;  %v1811_v23 = vadd.f32 %v1810_v47, %v1653_v55 }
 0x48d   : > { %v1814_v49 = vpop.f32.mrb[14].mxu0  ;;  %v1813_v57 = vadd.f32 %v1812_v48, %v1657_v56 }
 0x48e   : > { %v1444_v36 = vsel %vm1436_vm12, %v1430_v33, %v1440_v34  ;;  %v1815_v50 = vpop.f32.mrb[15].mxu0  ;;  %vm1899_vm13 = vcmp.gt.f32.partialorder %v1811_v23, 0.0 }
 0x48f   : > { %v1446_v37 = vmax.f32 %v1443_v35, %v1444_v36  ;;  %v1906_v60 = vmul.f32 0.01, %v1813_v57  ;;  %vm1900_vm14 = vcmp.gt.f32.partialorder %v1813_v57, 0.0 }
 0x491   : > { %v1448_v40 = vpack.c.bf16 %v1446_v37, %v1446_v37  ;;  %v1912_v7 = vsel %vm1900_vm14, %v1813_v57, %v1906_v60  ;;  %v3537_v60 = vld [vmem:[%s4308_s16 + $0x1c0] sm:$0xff]  }
 0x493   : > { %1616 = vmatprep.mubr.bf16.mxu1 %v1448_v40 }
 0x494   : > { %1617 = vmatmul.mubr.bf16.vlgmr.msra.gmra.mrb[16].mxu1 %v1447_v45 }
 0x495   : > { %1859 = vmatpush1.bf16.msra.mxu1 %v3527_v43  ;;  %1890 = vmatprep.mubr.bf16.mxu1 %v3892_v0 }
 0x496   : > { %1860 = vmatprep.subr.bf16.mxu1 %v3532_v24 }
 0x497   : > { %v1851_v51 = vpop.f32.mrb[16].mxu0 }
 0x498   : > { %v1853_v0 = vpop.f32.mrb[17].mxu0  ;;  %v1852_v61 = vadd.f32 %v1851_v51, %v1661_v58 }
 0x499   : > { %1861 = vmatpush1.bf16.msra.mxu1 %v3530_v19  ;;  %v1855_v52 = vpop.f32.mrb[18].mxu0  ;;  %v1854_v9 = vadd.f32 %v1853_v0, %v1665_v62  ;;  %v3539_v62 = vld [vmem:[%s4308_s16 + $0x148] sm:$0xff]  }
 0x49a   : > { %3004 = vmatprep.subr.msk.bf16.mxu1 %vm763_vm0, %v2999_v17  ;;  %v1856_v53 = vpop.f32.mrb[19].mxu0  ;;  %v1907_v8 = vmul.f32 0.01, %v1852_v61  ;;  %vm1901_vm15 = vcmp.gt.f32.partialorder %v1852_v61, 0.0 }
 0x49b   : > { %v1908_v14 = vmul.f32 0.01, %v1854_v9 }
 0x49c   : > { %v1913_v13 = vsel %vm1901_vm15, %v1852_v61, %v1907_v8  ;;  %v3538_v61 = vld [vmem:[%s4308_s16 + $0x180] sm:$0xff]   ;;  %v3549_v8 = vld [vmem:[%s4308_s16 + $0x1d8] sm:$0xff]  }
 0x49d   : > { %1863 = vmatpush1.bf16.msra.mxu1 %v1771_v20 }
 0x49e   : > { %3273 = vmatprep.subr.bf16.mxu1 %v3537_v60 }
 0x4a0   : > { %3005 = vmatmul.mubr.msk.bf16.vlgmr.msra.gmra.mrb[20].mxu1 %vm759_vm1, %v4475_v39  ;;  %v1905_v39 = vmul.f32 0.01, %v1811_v23  ;;  %vm1902_vm1 = vcmp.gt.f32.partialorder %v1854_v9, 0.0 }
 0x4a1   : > { %v1914_v25 = vsel %vm1902_vm1, %v1854_v9, %v1908_v14  ;;  %3274 = vmatpush3.bf16.msra.mxu1 %v3538_v61  ;;  %v3548_v9 = vld [vmem:[%s4308_s16 + $0x118] sm:$0xff]   ;;  %v3554_v14 = vld [vmem:[%s4308_s16 + $0x1a0] sm:$0xff]  }
 0x4a2   : > { %v1911_v6 = vsel %vm1899_vm13, %v1811_v23, %v1905_v39  ;;  %v3535_v39 = vld [vmem:[%s4308_s16 + $0x140] sm:$0xff]  }
 0x4a3   : > { %v1917_v11 = vadd.f32 %v1912_v7, %v1911_v6  ;;  %3245 = vmatprep.subr.bf16.mxu0 %v3535_v39 }
 0x4a5   : > { %v1918_v21 = vadd.f32 %v1917_v11, %v1913_v13  ;;  %v3551_v11 = vld [vmem:[%s4308_s16 + $0x160] sm:$0xff]  }
 0x4a7   : > { %v1919_v35 = vadd.f32 %v1918_v21, %v1914_v25  ;;  %v3556_v21 = vld [vmem:[%s4308_s16 + $0x128] sm:$0xff]  }
 0x567   : > { %v3239_v59 = vpop.f32.mrb[16].mxu1 }
 0x568   : > { %v3240_v1 = vpop.f32.mrb[17].mxu1 }
 0x569   : > { %v3241_v2 = vadd.f32 %v3240_v1, %v3239_v59  ;;  %v3242_v3 = vpop.f32.mrb[18].mxu1  ;;  %v3536_v59 = vld [vmem:[%s4308_s16 + $0x100] sm:$0xff]   ;;  %v3540_v1 = vld [vmem:[%s4308_s16 + $0x108] sm:$0xff]  }
 0x56a   : > { %v3243_v4 = vpop.f32.mrb[19].mxu1  ;;  %3246 = vmatpush3.bf16.msra.mxu0 %v3536_v59  ;;  %v3543_v3 = vld [vmem:[%s4308_s16 + $0x150] sm:$0xff]  }
 0x56b   : > { %v1619_v5 = vadd.f32 %v3241_v2, %v2948_v63  ;;  %v3541_v63 = vld [vmem:[%s4308_s16 + $0x1c8] sm:$0xff]   ;;  %3247 = vmatprep.subr.bf16.mxu0 %v3539_v62  ;;  %v3545_v4 = vld [vmem:[%s4308_s16 + $0x1d0] sm:$0xff]  }
 0x56c   : > { %v3542_v2 = vld [vmem:[%s4308_s16 + $0x188] sm:$0xff]   ;;  %3275 = vmatprep.subr.bf16.mxu1 %v3541_v63 }
 0x56d   : > { %vm1624_vm0 = vcmp.gt.f32.partialorder %v1619_v5, 0.0  ;;  %v1625_v10 = vmul.f32 0.01, %v1619_v5  ;;  %3276 = vmatpush3.bf16.msra.mxu1 %v3542_v2 }
 0x56e   : > { %3248 = vmatpush3.bf16.msra.mxu0 %v3540_v1  ;;  %3277 = vmatprep.subr.bf16.mxu1 %v3545_v4 }
 0x56f   : > { %v1626_v12 = vsel %vm1624_vm0, %v1619_v5, %v1625_v10  ;;  %v3544_v5 = vld [vmem:[%s4308_s16 + $0x110] sm:$0xff]   ;;  %3249 = vmatprep.subr.bf16.mxu0 %v3543_v3  ;;  %v3550_v10 = vld [vmem:[%s4308_s16 + $0x198] sm:$0xff]   ;;  %v3567_v3 = vld [vmem:[%s4447_s14 + $0xc0] sm:$0xff]  }
 0x570   : > { %1627 = vst [vmem:[%s4529_s21] sm:$0xff] %v1626_v12  ;;  %v3553_v12 = vld [vmem:[%s4308_s16 + $0x1e0] sm:$0xff]  }
 0x572   : > { %3250 = vmatpush3.bf16.msra.mxu0 %v3544_v5 }
 0x573   : > { %v1892_v22 = vpop.f32.mrb[20].mxu1 }
 0x574   : > { %v1893_v26 = vadd.f32 %v1892_v22, %v1669_v15  ;;  %v1894_v27 = vpop.f32.mrb[21].mxu1  ;;  %v3555_v15 = vld [vmem:[%s4308_s16 + $0x168] sm:$0xff]  }
 0x575   : > { %v1895_v28 = vadd.f32 %v1894_v27, %v1673_v16  ;;  %v1896_v31 = vpop.f32.mrb[22].mxu1  ;;  %v3557_v16 = vld [vmem:[%s4308_s16 + $0x1e8] sm:$0xff]  }
 0x576   : > { %vm1903_vm2 = vcmp.gt.f32.partialorder %v1893_v26, 0.0  ;;  %v1909_v32 = vmul.f32 0.01, %v1893_v26  ;;  %v1897_v33 = vpop.f32.mrb[23].mxu1  ;;  %v3558_v22 = vld [vmem:[%s4308_s16 + $0x1a8] sm:$0xff]  }
 0x577   : > { %vm1904_vm3 = vcmp.gt.f32.partialorder %v1895_v28, 0.0  ;;  %v1910_v34 = vmul.f32 0.01, %v1895_v28  ;;  %v3006_v33 = vld [vmem:[%s516_s28 + $0x6] sm:$0x3f] }
 0x578   : > { %v1915_v36 = vsel %vm1903_vm2, %v1893_v26, %v1909_v32  ;;  %v3560_v26 = vld [vmem:[%s4308_s16 + $0x130] sm:$0xff]  }
 0x579   : > { %v1916_v37 = vsel %vm1904_vm3, %v1895_v28, %v1910_v34  ;;  %v1920_v40 = vadd.f32 %v1919_v35, %v1915_v36  ;;  %v3561_v32 = vld [vmem:[%s4308_s16 + $0x1f0] sm:$0xff]  }
 0x57a   : > { %v1921_v43 = vsel %vm927_vm8, %v1916_v37, 0.0  ;;  %v3562_v34 = vld [vmem:[%s4308_s16 + $0x1b0] sm:$0xff]  }
 0x57b   : > { %v1922_v45 = vadd.f32 %v1921_v43, %v1920_v40  ;;  %v3007_v35 = vld [vmem:[%s525_s1 + $0x6] sm:$0x3f]  ;;  %v1965_v40 = vrot.slane %v3006_v33, %v4344_v30  ;;  %v1969_v43 = vrot.slane %v3006_v33, %v4352_v41  ;;  %s4746_s1 = smov %s4745_s30 }
 0x57c   : > { %v2020_v2 = vrot.slane %v3007_v35, %v4350_v38 }
 0x57d   : > { %1923 = vadd.xlane.f32.xlu1 %v1922_v45  ;;  %v1961_v45 = vrot.slane %v3006_v33, %v4342_v29 }
 0x60a   : > { %v1924_v24 = vpop.xlane.xlu1 %1923 }
 0x60b   : > { %v1925_v18 = vmul.f32 0.0014204546, %v1924_v24  ;;  %v1973_v24 = vrot.slane %v3006_v33, %v4356_v44 }
 0x60d   : > { %v4534_v19 = vsub.f32 %v1911_v6, %v1925_v18  ;;  %v4536_v17 = vsub.f32 %v1912_v7, %v1925_v18  ;;  %v4538_v46 = vsub.f32 %v1913_v13, %v1925_v18  ;;  %v4540_v20 = vsub.f32 %v1914_v25, %v1925_v18  ;;  %v3546_v6 = vld [vmem:[%s4308_s16 + $0x190] sm:$0xff]   ;;  %v3547_v7 = vld [vmem:[%s4308_s16 + $0x158] sm:$0xff]   ;;  %v3552_v13 = vld [vmem:[%s4308_s16 + $0x120] sm:$0xff]  }
 0x60e   : > { %v4546_v49 = vsub.f32 %v1916_v37, %v1925_v18  ;;  %v4548_v50 = vsub.f32 %v1915_v36, %v1925_v18  ;;  %3278 = vmatpush3.bf16.msra.mxu1 %v3546_v6  ;;  %3251 = vmatprep.subr.bf16.mxu0 %v3547_v7  ;;  %v3559_v25 = vld [vmem:[%s4308_s16 + $0x170] sm:$0xff]   ;;  %v3563_v36 = vld [vmem:[%s4308_s16 + $0x178] sm:$0xff]  }
 0x60f   : > { %v1932_v47 = vmul.f32 %v4534_v19, %v4534_v19  ;;  %v1933_v48 = vmul.f32 %v4536_v17, %v4536_v17  ;;  %v1934_v51 = vmul.f32 %v4538_v46, %v4538_v46  ;;  %v1935_v52 = vmul.f32 %v4540_v20, %v4540_v20  ;;  %3279 = vmatprep.subr.bf16.mxu1 %v3549_v8  ;;  %v3564_v37 = vld [vmem:[%s4308_s16 + $0x138] sm:$0xff]  }
 0x610   : > { %v1937_v54 = vmul.f32 %v4546_v49, %v4546_v49  ;;  %v1936_v55 = vmul.f32 %v4548_v50, %v4548_v50  ;;  %3252 = vmatpush3.bf16.msra.mxu0 %v3548_v9  ;;  %v3565_v18 = vld [vmem:[%s4308_s16 + $0x1f8] sm:$0xff]  }
 0x611   : > { %v1938_v0 = vadd.f32 %v1933_v48, %v1932_v47  ;;  %3253 = vmatprep.subr.bf16.mxu0 %v3551_v11  ;;  %v2004_v48 = vrot.slane %v3007_v35, %v4344_v30  ;;  %v1977_v30 = vrot.slane %v3006_v33, %v4354_v42 }
 0x612   : > { %v1942_v57 = vsel %vm927_vm8, %v1937_v54, 0.0  ;;  %3280 = vmatpush3.bf16.msra.mxu1 %v3550_v10 }
 0x613   : > { %v1939_v53 = vadd.f32 %v1938_v0, %v1934_v51  ;;  %3281 = vmatprep.subr.bf16.mxu1 %v3553_v12  ;;  %v2008_v51 = vrot.slane %v3007_v35, %v4352_v41  ;;  %v2000_v0 = vrot.slane %v3007_v35, %v4342_v29 }
 0x614   : > { %3254 = vmatpush3.bf16.msra.mxu0 %v3552_v13 }
 0x615   : > { %v1940_v56 = vadd.f32 %v1939_v53, %v1935_v52  ;;  %3255 = vmatprep.subr.bf16.mxu0 %v3555_v15  ;;  %v2012_v52 = vrot.slane %v3007_v35, %v4356_v44  ;;  %v3566_v53 = vld [vmem:[%s4308_s16 + $0x1b8] sm:$0xff]   ;;  %v3568_v15 = vld [vmem:[%s4447_s14 + $0x80] sm:$0xff]   ;;  %s2627_s16 = scalar_lea.sflag [#allocation4], %s4277_s11 }
 0x616   : > { %3282 = vmatpush3.bf16.msra.mxu1 %v3554_v14 }
 0x617   : > { %v1941_v23 = vadd.f32 %v1940_v56, %v1936_v55  ;;  %3283 = vmatprep.subr.bf16.mxu1 %v3557_v16 }
 0x618   : > { %3256 = vmatpush3.bf16.msra.mxu0 %v3556_v21 }
 0x619   : > { %v1943_v58 = vadd.f32 %v1942_v57, %v1941_v23  ;;  %3257 = vmatprep.subr.bf16.mxu0 %v3559_v25 }
 0x61a   : > { %3284 = vmatpush3.bf16.msra.mxu1 %v3558_v22  ;;  %v3569_v22 = vld [vmem:[%s4447_s14 + $0xc8] sm:$0xff]  }
 0x61b   : > { %1944 = vadd.xlane.f32.xlu0 %v1943_v58  ;;  %3285 = vmatprep.subr.bf16.mxu1 %v3561_v32  ;;  %v3572_v32 = vld [vmem:[%s4447_s14 + $0x90] sm:$0xff]  }
 0x61c   : > { %3258 = vmatpush3.bf16.msra.mxu0 %v3560_v26 }
 0x61d   : > { %3259 = vmatprep.subr.bf16.mxu0 %v3563_v36  ;;  %v3576_v36 = vld [vmem:[%s4447_s14 + $0xa0] sm:$0xff]  }
 0x61e   : > { %3286 = vmatpush3.bf16.msra.mxu1 %v3562_v34  ;;  %v3574_v34 = vld [vmem:[%s4447_s14 + $0x98] sm:$0xff]  }
 0x61f   : > { %3287 = vmatprep.subr.bf16.mxu1 %v3565_v18  ;;  %v3582_v18 = vld [vmem:[%s4447_s14 + $0xb8] sm:$0xff]  }
 0x620   : > { %3260 = vmatpush3.bf16.msra.mxu0 %v3564_v37  ;;  %v3577_v37 = vld [vmem:[%s4447_s14 + $0xe8] sm:$0xff]  }
 0x621   : > { %3301 = vmatprep.subr.bf16.mxu0 %v3567_v3 }
 0x622   : > { %3288 = vmatpush3.bf16.msra.mxu1 %v3566_v53 }
 0x6a8   : > { %v1945_v27 = vpop.xlane.xlu0 %1944 }
 0x6a9   : > { %v1946_v28 = vmul.f32 0.0014204546, %v1945_v27  ;;  %v3570_v27 = vld [vmem:[%s4447_s14 + $0x88] sm:$0xff]  }
 0x6ab   : > { %v1947_v31 = vadd.f32 1e-05, %v1946_v28 }
 0x6ad   : > { %3585 = vrsqrt.f32 %v1947_v31  ;;  %v3571_v31 = vld [vmem:[%s4447_s14 + $0xd0] sm:$0xff]  }
 0x6b7   : > { %v3586_v47 = vpop.eup %3585 }
 0x6b8   : > { %v1950_v54 = vmul.f32 %v3586_v47, %v4536_v17  ;;  %v1951_v55 = vmul.f32 %v3586_v47, %v4538_v46  ;;  %v1949_v56 = vmul.f32 %v3586_v47, %v4534_v19  ;;  %v1952_v23 = vmul.f32 %v3586_v47, %v4540_v20 }
 0x6b9   : > { %v1953_v57 = vmul.f32 %v3586_v47, %v4548_v50  ;;  %v2016_v46 = vrot.slane %v3007_v35, %v4354_v42  ;;  %v1981_v19 = vrot.slane %v3006_v33, %v4350_v38  ;;  %v1954_v50 = vmul.f32 %v3586_v47, %v4546_v49  ;;  %v3573_v33 = vld [vmem:[%s4447_s14 + $0xd8] sm:$0xff]   ;;  %v3575_v35 = vld [vmem:[%s4447_s14 + $0xe0] sm:$0xff]  }
 0x6ba   : > { %v1989_v41 = vmul.f32 %v1965_v40, %v1950_v54  ;;  %v1990_v29 = vmul.f32 %v1969_v43, %v1951_v55  ;;  %v1988_v58 = vmul.f32 %v1961_v45, %v1949_v56  ;;  %v1991_v44 = vmul.f32 %v1973_v24, %v1952_v23  ;;  %v3578_v40 = vld [vmem:[%s4447_s14 + $0xa8] sm:$0xff]   ;;  %v3579_v43 = vld [vmem:[%s4447_s14 + $0xf0] sm:$0xff]   ;;  %v3581_v24 = vld [vmem:[%s4447_s14 + $0xf8] sm:$0xff]  }
 0x6bb   : > { %v1992_v62 = vmul.f32 %v1977_v30, %v1953_v57  ;;  %v1993_v1 = vmul.f32 %v1981_v19, %v1954_v50  ;;  %v3580_v45 = vld [vmem:[%s4447_s14 + $0xb0] sm:$0xff]   ;;  %s3803_s14 = scalar_lea.vmem %s3802_s22, 512 }
 0x6bc   : > { %v2028_v39 = vadd.f32 %v2004_v48, %v1989_v41  ;;  %v2029_v59 = vadd.f32 %v2008_v51, %v1990_v29  ;;  %v2027_v17 = vadd.f32 %v2000_v0, %v1988_v58  ;;  %v2030_v60 = vadd.f32 %v2012_v52, %v1991_v44  ;;  %v3073_v48 = vld [vmem:[%s4501_s23 + $0x1] ss:$0 sm:$0xff] }
 0x6bd   : > { %v2031_v63 = vadd.f32 %v2016_v46, %v1992_v62  ;;  %v2032_v42 = vadd.f32 %v2020_v2, %v1993_v1 }
 0x6be   : > { %v3429_v20 = vpack.i.bf16 %v2029_v59, %v2028_v39  ;;  %v3434_v61 = vpack.i.bf16 %v2030_v60, %v2027_v17 }
 0x6c0   : > { %3430 = vrot.lane.b32.xlu1 %v3429_v20, %s3893_s19  ;;  %3435 = vrot.lane.b32.xlu0 %v3434_v61, %s3893_s19 }
 0x6c4   : > { %2046 = vrot.lane.b32.xlu1 %v2031_v63, %s3893_s19 }
 0x6c8   : > { %2057 = vrot.lane.b32.xlu1 %v2032_v42, %s3893_s19  ;;  %s3797_s19 = scalar_lea.vmem %s4647_s15, 256 }
 0x6c9   : > { %p3798_p0 = scmp.ne.s32.totalorder %s4647_s15, %s3797_s19  ;;  %p3805_p5 = scmp.lt.s32.totalorder %s3803_s14, %s3797_s19 }
 0x6cb   : > { %p3799_p11 = pnand %p3798_p0, %p4747_p10  ;;  %p3806_p1 = por %p3805_p5, %p3804_p4 }
 0x6cd   : > { %p3800_p8 = pneg %p3799_p11 }
 0x6cf   : > { %p3807_p3 = pnand %p3806_p1, %p3800_p8 }
 0x732   : > { %v3431_v4 = vpop.permute.xlu1 %3430  ;;  %v3436_v5 = vpop.permute.xlu0 %3435 }
 0x733   : > { %v3433_v49 = vunpack.i.h.bf16 %v3431_v4  ;;  %v3432_v6 = vunpack.i.l.bf16 %v3431_v4  ;;  %v3438_v7 = vunpack.i.h.bf16 %v3436_v5  ;;  %v3437_v8 = vunpack.i.l.bf16 %v3436_v5 }
 0x735   : > { %v2048_v9 = vsel %vm927_vm8, %v3437_v8, %v3432_v6  ;;  %v2049_v10 = vsel %vm927_vm8, %v3432_v6, %v3433_v49  ;;  %v2050_v38 = vsel %vm927_vm8, %v3433_v49, %v3438_v7 }
 0x736   : > { %v2061_v11 = vpack.c.bf16 %v2048_v9, %v2027_v17  ;;  %v2047_v12 = vpop.permute.xlu1 %2046  ;;  %v2062_v13 = vpack.c.bf16 %v2049_v10, %v2028_v39  ;;  %v2063_v21 = vpack.c.bf16 %v2050_v38, %v2029_v59 }
 0x737   : > { %v2051_v14 = vsel %vm927_vm8, %v3438_v7, %v2047_v12 }
 0x738   : > { %v2064_v16 = vpack.c.bf16 %v2051_v14, %v2030_v60  ;;  %2363 = vmatprep.mubr.bf16.mxu0 %v2062_v13 }
 0x739   : > { %2364 = vmatmul.mubr.bf16.vlgmr.msra.gmra.mrb[20].mxu0 %v2061_v11 }
 0x73a   : > { %v2058_v25 = vpop.permute.xlu1 %2057  ;;  %2371 = vmatprep.mubr.bf16.mxu0 %v2063_v21  ;;  %2412 = vmatprep.mubr.bf16.mxu1 %v2064_v16 }
 0x73b   : > { %v2059_v26 = vsel %vm927_vm8, %v2047_v12, %v2058_v25  ;;  %2413 = vmatmul.mubr.bf16.vlgmr.msra.gmra.mrb[24].mxu1 %v2063_v21  ;;  %3302 = vmatpush3.bf16.msra.mxu0 %v3568_v15  ;;  %v3139_v21 = vld [vmem:[%s4522_s8 + $0x1] ss:$0 sm:$0xff] }
 0x73c   : > { %v2065_v28 = vpack.c.bf16 %v2059_v26, %v2031_v63  ;;  %3303 = vmatprep.subr.bf16.mxu0 %v3569_v22 }
 0x73e   : > { %2420 = vmatprep.mubr.bf16.mxu1 %v2065_v28 }
 0x73f   : > { %3304 = vmatpush3.bf16.msra.mxu0 %v3570_v27 }
 0x740   : > { %3305 = vmatprep.subr.bf16.mxu0 %v3571_v31 }
 0x741   : > { %2372 = vmatmul.mubr.bf16.gmra.mrb[24].mxu0 %v2062_v13 }
 0x743   : > { %2421 = vmatmul.mubr.bf16.gmra.mrb[28].mxu1 %v2064_v16  ;;  %3306 = vmatpush3.bf16.msra.mxu0 %v3572_v32 }
 0x744   : > { %3307 = vmatprep.subr.bf16.mxu0 %v3573_v33 }
 0x747   : > { %3308 = vmatpush3.bf16.msra.mxu0 %v3574_v34 }
 0x748   : > { %3309 = vmatprep.subr.bf16.mxu0 %v3575_v35 }
 0x74b   : > { %3310 = vmatpush3.bf16.msra.mxu0 %v3576_v36 }
 0x74c   : > { %3311 = vmatprep.subr.bf16.mxu0 %v3577_v37 }
 0x74f   : > { %3312 = vmatpush3.bf16.msra.mxu0 %v3578_v40 }
 0x750   : > { %3313 = vmatprep.subr.bf16.mxu0 %v3579_v43 }
 0x753   : > { %3314 = vmatpush3.bf16.msra.mxu0 %v3580_v45 }
 0x754   : > { %3315 = vmatprep.subr.bf16.mxu0 %v3581_v24 }
 0x757   : > { %3316 = vmatpush3.bf16.msra.mxu0 %v3582_v18 }
 0x80c   : > { %v3261_v47 = vpop.f32.mrb[20].mxu0 }
 0x80d   : > { %v3262_v51 = vpop.f32.mrb[21].mxu0 }
 0x80e   : > { %v3263_v0 = vadd.f32 %v3262_v51, %v3261_v47  ;;  %v3264_v52 = vpop.f32.mrb[22].mxu0  ;;  %v3289_v53 = vpop.f32.mrb[24].mxu1 }
 0x80f   : > { %v3265_v54 = vpop.f32.mrb[23].mxu0  ;;  %v3290_v55 = vpop.f32.mrb[25].mxu1 }
 0x810   : > { %v2366_v56 = vadd.f32 %v3263_v0, %v3073_v48  ;;  %v3266_v23 = vadd.f32 %v3265_v54, %v3264_v52  ;;  %v3291_v57 = vadd.f32 %v3290_v55, %v3289_v53  ;;  %v3292_v30 = vpop.f32.mrb[26].mxu1 }
 0x811   : > { %v3293_v41 = vpop.f32.mrb[27].mxu1 }
 0x812   : > { %v2369_v29 = vadd.f32 %v3266_v23, %v3073_v48  ;;  %v2415_v58 = vadd.f32 %v3291_v57, %v2366_v56  ;;  %v3294_v44 = vadd.f32 %v3293_v41, %v3292_v30 }
 0x814   : > { %vm2429_vm4 = vcmp.gt.f32.partialorder %v2415_v58, 0.0  ;;  %v2433_v39 = vmul.f32 0.01, %v2415_v58  ;;  %v2418_v59 = vadd.f32 %v3294_v44, %v2369_v29  ;;  %v3267_v17 = vpop.f32.mrb[24].mxu0 }
 0x815   : > { %v3268_v60 = vpop.f32.mrb[25].mxu0 }
 0x816   : > { %vm2430_vm5 = vcmp.gt.f32.partialorder %v2418_v59, 0.0  ;;  %v2434_v46 = vmul.f32 0.01, %v2418_v59  ;;  %v3269_v19 = vadd.f32 %v3268_v60, %v3267_v17  ;;  %v3270_v20 = vpop.f32.mrb[26].mxu0  ;;  %v3295_v61 = vpop.f32.mrb[28].mxu1  ;;  %v2437_v62 = vsel %vm2429_vm4, %v2415_v58, %v2433_v39 }
 0x817   : > { %v3271_v50 = vpop.f32.mrb[27].mxu0  ;;  %v3296_v63 = vpop.f32.mrb[29].mxu1 }
 0x818   : > { %v2438_v1 = vsel %vm2430_vm5, %v2418_v59, %v2434_v46  ;;  %v2374_v2 = vadd.f32 %v3269_v19, %v3073_v48  ;;  %v3272_v3 = vadd.f32 %v3271_v50, %v3270_v20  ;;  %v3297_v42 = vadd.f32 %v3296_v63, %v3295_v61  ;;  %v3298_v4 = vpop.f32.mrb[30].mxu1 }
 0x819   : > { %v2441_v5 = vmax.f32 %v2437_v62, %v2438_v1  ;;  %v3299_v49 = vpop.f32.mrb[31].mxu1 }
 0x81a   : > { %v2377_v6 = vadd.f32 %v3272_v3, %v3073_v48  ;;  %v2423_v7 = vadd.f32 %v3297_v42, %v2374_v2  ;;  %v3300_v8 = vadd.f32 %v3299_v49, %v3298_v4 }
 0x81b   : > { %v2443_v15 = vpack.c.bf16 %v2441_v5, %v2441_v5 }
 0x81c   : > { %v2435_v9 = vmul.f32 0.01, %v2423_v7  ;;  %v2426_v10 = vadd.f32 %v3300_v8, %v2377_v6  ;;  %vm2431_vm6 = vcmp.gt.f32.partialorder %v2423_v7, 0.0 }
 0x81e   : > { %vm2432_vm7 = vcmp.gt.f32.partialorder %v2426_v10, 0.0  ;;  %v2436_v38 = vmul.f32 0.01, %v2426_v10  ;;  %v2439_v11 = vsel %vm2431_vm6, %v2423_v7, %v2435_v9 }
 0x820   : > { %v2440_v12 = vsel %vm2432_vm7, %v2426_v10, %v2436_v38 }
 0x821   : > { %v2442_v13 = vmax.f32 %v2439_v11, %v2440_v12 }
 0x823   : > { %v2444_v14 = vpack.c.bf16 %v2442_v13, %v2442_v13 }
 0x825   : > { %2614 = vmatprep.mubr.bf16.mxu0 %v2444_v14 }
 0x826   : > { %2615 = vmatmul.mubr.bf16.vlgmr.msra.gmra.mrb[28].mxu0 %v2443_v15 }
 0x8f9   : > { %v3317_v16 = vpop.f32.mrb[28].mxu0 }
 0x8fa   : > { %v3318_v22 = vpop.f32.mrb[29].mxu0 }
 0x8fb   : > { %v3319_v25 = vadd.f32 %v3318_v22, %v3317_v16  ;;  %v3320_v26 = vpop.f32.mrb[30].mxu0 }
 0x8fc   : > { %v3321_v27 = vpop.f32.mrb[31].mxu0 }
 0x8fd   : > { %v2617_v28 = vadd.f32 %v3319_v25, %v3139_v21 }
 0x8ff   : > { %vm2622_vm8 = vcmp.gt.f32.partialorder %v2617_v28, 0.0  ;;  %v2623_v31 = vmul.f32 0.01, %v2617_v28 }
 0x901   : > { %v2624_v32 = vsel %vm2622_vm8, %v2617_v28, %v2623_v31 }
 0x902   : > { %2625 = vst [vmem:[%s4529_s21 + $0x8] sm:$0xff] %v2624_v32 }
 0x903   : > { %3810 = shalt.err (!%p3807_p3)
}
 0x904   : > { %s3811_s11 = scalar_lea.hbm %s4645_s20, 256  ;;  %s3815_s18 = scalar_lea.hbm %s4746_s1, 512 }
 0x905   : > { %p3812_p7 = scmp.ne.s32.totalorder %s4645_s20, %s3811_s11  ;;  %p3816_p2 = scmp.lt.u32.totalorder %s4645_s20, %s4746_s1 }
 0x906   : > { %p3817_p6 = scmp.lt.u32.totalorder %s3815_s18, %s3811_s11  ;;  %p3819_p0 = scmp.lt.u32.totalorder %s3811_s11, %s4645_s20 }
 0x907   : > { %p3813_p12 = pnand %p3812_p7, %p4747_p10 }
 0x908   : > { %p3818_p13 = por %p3817_p6, %p3816_p2 }
 0x909   : > { %p3814_p9 = pneg %p3813_p12 }
 0x90a   : > { %p3820_p11 = por %p3819_p0, %p3818_p13 }
 0x90c   : > { %p3821_p8 = pnand %p3820_p11, %p3814_p9 }
 0x90e   : > { %3824 = shalt.err (!%p3821_p8)
}
 0x90f   : > { %3347 = dma.vmem_to_hbm [thread:$0]  (%p4747_p10), %s4647_s15, 256, %s4645_s20, %s2627_s16  }
 0x910 PF: > { %s4748_s24 = sld [smem:[#allocation20_spill]]  ;;  %s4749_s26 = sld [smem:[#allocation25_spill]] }
 0x911   : > { %p4751_p5 = scmp.ge.s32.totalorder %s3875_s12, 2 }
 0x916   : > { %s2653_s8 = sand.u32 1, %s4748_s24   ;;  %p4750_p4 = scmp.ne.s32.totalorder %s4749_s26, 0 }
 0x917   : > { %s2654_s21 = scalar_lea.sflag [#allocation4], %s2653_s8 }
 0x918   : > { %p3372_p1 = pnand %p4751_p5, %p4750_p4 }
 0x91a   : > { %3858 = dma.done.wait (!%p3372_p1), %s2654_s21, 256  }
 0x91b   : > { %3860 = vsyncadd (!%p3372_p1), %s2654_s21, 4294967040  ;;  %s4752_s12 = sld [smem:[#allocation22_spill]]  ;;  %s4753_s27 = sld [smem:[#allocation21_spill]] }
 0x91c   : > { %s4754_s11 = sld [smem:[#allocation23_spill]]  ;;  %s4755_s30 = smov %s3867_s10 }
 0x921   : > { %p31_p3 = scmp.ge.s32.totalorder %s4752_s12, 4   ;;  %s4756_s10 = smov %s4753_s27 }
 0x923   :  { %33 = sbr.rel (!%p31_p3) target bundleno = 16 (0x10), region = 188 }
 0x92a   :  { %2659 = vsyncpa [#allocation3], 1 }
 0x92b   :  { %2661 = vsyncpa [#allocation3 + $0x1], 1 }
 0x92c   :  { %2662 = vsyncpa [#allocation6], 1 }
 0x92d   :  { %2664 = vsyncpa [#allocation6 + $0x1], 1 }
 0x92e   :  { %2665 = vsyncpa [#allocation9], 1 }
 0x92f   :  { %2667 = vsyncpa [#allocation9 + $0x1], 1 }
 0x930   :  { %2668 = vsyncpa [#allocation12], 1 }
 0x931   :  { %2670 = vsyncpa [#allocation12 + $0x1], 1 }
 0x932   :  { %2671 = vsyncpa [#allocation4], 1 }
 0x933   :  { %2673 = vsyncpa [#allocation4 + $0x1], 1 }

</bundles_post_ra>
